<compile_context>
chip_gen: v7x
topology: tpu7x:2x2x1
jax: 0.10.0
libtpu: 0.0.40
codegen_flags: <defaults>
</compile_context>

<pallas_src>
import functools

import jax
import jax.numpy as jnp
from jax.experimental import pallas as pl
from jax.experimental.pallas import tpu as pltpu

IN_DIM = 28 * 28        # 784 == full last dim of x, so the (8,128) rule is satisfied
HIDDEN_1 = 512
HIDDEN_2 = 512
OUT_DIM = 10
OUT_PAD = 128           # lane-dense output width (unmasked vst on the store)
TILE_B = 256            # batch tile; multiple of 256 fills the v6e/v7x MXU rows


def _round_up(n, m):
    return ((n + m - 1) // m) * m


def _mlp_kernel(x_ref, w1_ref, b1_ref, w2_ref, b2_ref, w3_ref, b3_ref, o_ref):
    # x: [tb, 784] f32 tile; weights bf16; biases f32; output f32 lane-dense [tb, 128].
    x = x_ref[...].astype(jnp.bfloat16)   # VPU cast, hidden under the MXU work

    # fc1 + ReLU (bf16 x bf16 -> f32 accumulate; Mosaic pads K=784 tiles internally)
    h1 = jnp.dot(x, w1_ref[...], preferred_element_type=jnp.float32)
    h1 = jnp.maximum(h1 + b1_ref[...], 0.0).astype(jnp.bfloat16)
    # dropout(p=0.2) -> identity (eval mode)
    # TODO(synk): training-mode dropout (pltpu.prng_* mask + 1/(1-p) scale) not implemented.

    # fc2 + ReLU
    h2 = jnp.dot(h1, w2_ref[...], preferred_element_type=jnp.float32)
    h2 = jnp.maximum(h2 + b2_ref[...], 0.0).astype(jnp.bfloat16)
    # dropout(p=0.2) -> identity (eval mode)

    # fc3 (logits); padded columns of w3/b3 are zero so lanes 10..127 stay 0.
    o_ref[...] = (jnp.dot(h2, w3_ref[...], preferred_element_type=jnp.float32)
                  + b3_ref[...])                       # [tb, OUT_PAD]


@functools.partial(jax.jit, static_argnames=("tile_b",))
def mlp_forward(x_nchw, packed_params, tile_b=TILE_B):
    """x_nchw: [B, 1, 28, 28] float32 (NCHW). Returns logits [B, 10] float32."""
    w1, b1, w2, b2, w3, b3 = packed_params
    B = x_nchw.shape[0]

    # x.view(-1, 28*28): metadata-only reshape, no pad / cast / extra HBM pass.
    x_flat = x_nchw.reshape(B, IN_DIM)

    # Clamp the batch tile for tiny batches (keep it a multiple of 8 for sublanes);
    # partial last tile is handled by Pallas boundary-block masking.
    tb = min(tile_b, _round_up(B, 8))
    grid = (pl.cdiv(B, tb),)

    resident = lambda i: (0, 0)   # weights/biases: same block every step -> VMEM-resident

    flops = 2 * B * (IN_DIM * HIDDEN_1 + HIDDEN_1 * HIDDEN_2 + HIDDEN_2 * OUT_PAD)
    bytes_accessed = (B * IN_DIM * 4                                        # x (f32)
                      + (IN_DIM * HIDDEN_1 + HIDDEN_1 * HIDDEN_2
                         + HIDDEN_2 * OUT_PAD) * 2                          # weights (bf16)
                      + (HIDDEN_1 + HIDDEN_2 + OUT_PAD) * 4                 # biases (f32)
                      + B * OUT_PAD * 4)                                    # logits (f32)

    out = pl.pallas_call(
        _mlp_kernel,
        out_shape=jax.ShapeDtypeStruct((B, OUT_PAD), jnp.float32),
        grid=grid,
        in_specs=[
            pl.BlockSpec((tb, IN_DIM), lambda i: (i, 0)),      # x (batch-tiled, f32)
            pl.BlockSpec((IN_DIM, HIDDEN_1), resident),        # w1 (bf16, natural K=784)
            pl.BlockSpec((1, HIDDEN_1), resident),             # b1
            pl.BlockSpec((HIDDEN_1, HIDDEN_2), resident),      # w2
            pl.BlockSpec((1, HIDDEN_2), resident),             # b2
            pl.BlockSpec((HIDDEN_2, OUT_PAD), resident),       # w3 (N padded to 128)
            pl.BlockSpec((1, OUT_PAD), resident),              # b3 (padded)
        ],
        out_specs=pl.BlockSpec((tb, OUT_PAD), lambda i: (i, 0)),
        compiler_params=pltpu.CompilerParams(
            # Batch axis is fully independent.  On v7x, switching this to
            # pltpu.CORE_PARALLEL (with >=2 grid steps) forces 2-TC sharding;
            # plain "parallel" is kept here for v5e/v6e portability.
            dimension_semantics=("parallel",),
        ),
        cost_estimate=pl.CostEstimate(
            flops=flops, transcendentals=0, bytes_accessed=bytes_accessed),
    )(x_flat, w1, b1, w2, b2, w3, b3)

    # Lane-dense padded logits -> [B, 10]; trivial slice, fused by XLA downstream.
    return out[:, :OUT_DIM]


def init_params(key):
    """Deterministic init mirroring nn.Linear shapes (stored as [in, out], f32)."""
    k1, k2, k3, k4, k5, k6 = jax.random.split(key, 6)

    def linear(kw, kb, fan_in, fan_out):
        bound = 1.0 / jnp.sqrt(fan_in)
        w = jax.random.uniform(kw, (fan_in, fan_out), jnp.float32, -bound, bound)
        b = jax.random.uniform(kb, (1, fan_out), jnp.float32, -bound, bound)
        return w, b

    w1, b1 = linear(k1, k2, IN_DIM, HIDDEN_1)
    w2, b2 = linear(k3, k4, HIDDEN_1, HIDDEN_2)
    w3, b3 = linear(k5, k6, HIDDEN_2, OUT_DIM)
    return (w1, b1, w2, b2, w3, b3)


def pack_params(params):
    """Cast weights to bf16; pad fc3 output dim 10 -> 128; biases stay f32."""
    w1, b1, w2, b2, w3, b3 = params
    w3p = (jnp.zeros((HIDDEN_2, OUT_PAD), jnp.float32)
           .at[:, :OUT_DIM].set(w3)).astype(jnp.bfloat16)
    b3p = jnp.zeros((1, OUT_PAD), jnp.float32).at[:, :OUT_DIM].set(b3)
    return (w1.astype(jnp.bfloat16), b1.astype(jnp.float32),
            w2.astype(jnp.bfloat16), b2.astype(jnp.float32),
            w3p, b3p)


def reference_forward(x_nchw, packed_params):
    """Plain-JAX reference matching the kernel's bf16 numerics."""
    w1, b1, w2, b2, w3, b3 = packed_params
    B = x_nchw.shape[0]
    xf = x_nchw.reshape(B, IN_DIM).astype(jnp.bfloat16).astype(jnp.float32)
    h1 = jnp.maximum(xf @ w1.astype(jnp.float32) + b1, 0.0)
    h1 = h1.astype(jnp.bfloat16).astype(jnp.float32)
    h2 = jnp.maximum(h1 @ w2.astype(jnp.float32) + b2, 0.0)
    h2 = h2.astype(jnp.bfloat16).astype(jnp.float32)
    out = h2 @ w3.astype(jnp.float32) + b3
    return out[:, :OUT_DIM]


if __name__ == "__main__":
    key = jax.random.PRNGKey(0)
    kx, kp = jax.random.split(key)

    params = init_params(kp)
    packed = pack_params(params)

    # Small batch: tile clamps to 8 rows, single grid step, no padding copies.
    B = 8
    x = jax.random.normal(kx, (B, 1, 28, 28), dtype=jnp.float32)
    logits = mlp_forward(x, packed)
    jax.block_until_ready(logits)
    assert logits.shape == (B, OUT_DIM)
    ref = reference_forward(x, packed)
    assert jnp.allclose(logits, ref, atol=2e-2, rtol=2e-2)

    # Larger batch: exercises a 2-step grid with a partial (boundary) last tile.
    B2 = 300
    x2 = jax.random.normal(kx, (B2, 1, 28, 28), dtype=jnp.float32)
    logits2 = mlp_forward(x2, packed)
    jax.block_until_ready(logits2)
    assert logits2.shape == (B2, OUT_DIM)
    ref2 = reference_forward(x2, packed)
    assert jnp.allclose(logits2, ref2, atol=2e-2, rtol=2e-2)

    print("KERNEL_OK")
</pallas_src>

<mosaic_0001>
module attributes {stable_mosaic.version = 11 : i64} {
  func.func @_mlp_kernel(%arg0: i32, %arg1: memref<8x784xf32, #tpu.memory_space<vmem>>, %arg2: memref<784x512xbf16, #tpu.memory_space<vmem>>, %arg3: memref<1x512xf32, #tpu.memory_space<vmem>>, %arg4: memref<512x512xbf16, #tpu.memory_space<vmem>>, %arg5: memref<1x512xf32, #tpu.memory_space<vmem>>, %arg6: memref<512x128xbf16, #tpu.memory_space<vmem>>, %arg7: memref<1x128xf32, #tpu.memory_space<vmem>>, %arg8: memref<8x128xf32, #tpu.memory_space<vmem>>) attributes {dimension_semantics = [#tpu.dimension_semantics<parallel>], iteration_bounds = array<i64: 1>, scalar_prefetch = 0 : i64, scratch_operands = 0 : i64, tpu.core_type = #tpu.core_type<tc>, window_params = [{transform_indices = @transform_0, window_bounds = array<i64: 8, 784>}, {pipeline_mode = #tpu.pipeline_mode<synchronous>, transform_indices = @transform_1, window_bounds = array<i64: 784, 512>}, {pipeline_mode = #tpu.pipeline_mode<synchronous>, transform_indices = @transform_2, window_bounds = array<i64: 1, 512>}, {pipeline_mode = #tpu.pipeline_mode<synchronous>, transform_indices = @transform_3, window_bounds = array<i64: 512, 512>}, {pipeline_mode = #tpu.pipeline_mode<synchronous>, transform_indices = @transform_4, window_bounds = array<i64: 1, 512>}, {pipeline_mode = #tpu.pipeline_mode<synchronous>, transform_indices = @transform_5, window_bounds = array<i64: 512, 128>}, {pipeline_mode = #tpu.pipeline_mode<synchronous>, transform_indices = @transform_6, window_bounds = array<i64: 1, 128>}, {transform_indices = @transform_7, window_bounds = array<i64: 8, 128>}]} {
    %c0 = arith.constant 0 : index
    %c0_0 = arith.constant 0 : index
    %0 = vector.load %arg1[%c0, %c0_0] : memref<8x784xf32, #tpu.memory_space<vmem>>, vector<8x784xf32>
    %1 = arith.truncf %0 : vector<8x784xf32> to vector<8x784xbf16>
    %c0_1 = arith.constant 0 : index
    %c0_2 = arith.constant 0 : index
    %2 = vector.load %arg2[%c0_1, %c0_2] : memref<784x512xbf16, #tpu.memory_space<vmem>>, vector<784x512xbf16>
    %cst = arith.constant dense<0.000000e+00> : vector<8x512xf32>
    %3 = tpu.matmul %1, %2, %cst {dimension_numbers = #tpu.dot_dimension_numbers<[1], [0], [0], [1], [0, 0, 1, 1], [], []>} : vector<8x784xbf16>, vector<784x512xbf16>, vector<8x512xf32> -> vector<8x512xf32>
    %c0_3 = arith.constant 0 : index
    %c0_4 = arith.constant 0 : index
    %4 = vector.load %arg3[%c0_3, %c0_4] : memref<1x512xf32, #tpu.memory_space<vmem>>, vector<1x512xf32>
    %5 = vector.broadcast %4 : vector<1x512xf32> to vector<8x512xf32>
    %6 = arith.addf %3, %5 : vector<8x512xf32>
    %cst_5 = arith.constant 0.000000e+00 : f32
    %7 = vector.broadcast %cst_5 : f32 to vector<8x512xf32>
    %8 = arith.maximumf %6, %7 : vector<8x512xf32>
    %9 = arith.truncf %8 : vector<8x512xf32> to vector<8x512xbf16>
    %c0_6 = arith.constant 0 : index
    %c0_7 = arith.constant 0 : index
    %10 = vector.load %arg4[%c0_6, %c0_7] : memref<512x512xbf16, #tpu.memory_space<vmem>>, vector<512x512xbf16>
    %cst_8 = arith.constant dense<0.000000e+00> : vector<8x512xf32>
    %11 = tpu.matmul %9, %10, %cst_8 {dimension_numbers = #tpu.dot_dimension_numbers<[1], [0], [0], [1], [0, 0, 1, 1], [], []>} : vector<8x512xbf16>, vector<512x512xbf16>, vector<8x512xf32> -> vector<8x512xf32>
    %c0_9 = arith.constant 0 : index
    %c0_10 = arith.constant 0 : index
    %12 = vector.load %arg5[%c0_9, %c0_10] : memref<1x512xf32, #tpu.memory_space<vmem>>, vector<1x512xf32>
    %13 = vector.broadcast %12 : vector<1x512xf32> to vector<8x512xf32>
    %14 = arith.addf %11, %13 : vector<8x512xf32>
    %cst_11 = arith.constant 0.000000e+00 : f32
    %15 = vector.broadcast %cst_11 : f32 to vector<8x512xf32>
    %16 = arith.maximumf %14, %15 : vector<8x512xf32>
    %17 = arith.truncf %16 : vector<8x512xf32> to vector<8x512xbf16>
    %c0_12 = arith.constant 0 : index
    %c0_13 = arith.constant 0 : index
    %18 = vector.load %arg6[%c0_12, %c0_13] : memref<512x128xbf16, #tpu.memory_space<vmem>>, vector<512x128xbf16>
    %cst_14 = arith.constant dense<0.000000e+00> : vector<8x128xf32>
    %19 = tpu.matmul %17, %18, %cst_14 {dimension_numbers = #tpu.dot_dimension_numbers<[1], [0], [0], [1], [0, 0, 1, 1], [], []>} : vector<8x512xbf16>, vector<512x128xbf16>, vector<8x128xf32> -> vector<8x128xf32>
    %c0_15 = arith.constant 0 : index
    %c0_16 = arith.constant 0 : index
    %20 = vector.load %arg7[%c0_15, %c0_16] : memref<1x128xf32, #tpu.memory_space<vmem>>, vector<1x128xf32>
    %21 = vector.broadcast %20 : vector<1x128xf32> to vector<8x128xf32>
    %22 = arith.addf %19, %21 : vector<8x128xf32>
    %c0_17 = arith.constant 0 : index
    %c0_18 = arith.constant 0 : index
    %23 = vector.load %arg8[%c0_17, %c0_18] : memref<8x128xf32, #tpu.memory_space<vmem>>, vector<8x128xf32>
    tpu.vector_store %arg8[%c0_17, %c0_18], %22 {strides = array<i32>} : memref<8x128xf32, #tpu.memory_space<vmem>>, vector<8x128xf32>,
    return
  }
  func.func @transform_0(%arg0: i32) -> (i32, i32) {
    %c0_i32 = arith.constant 0 : i32
    %c0_i32_0 = arith.constant 0 : i32
    return %arg0, %c0_i32 : i32, i32
  }
  func.func @transform_1(%arg0: i32) -> (i32, i32) {
    %c0_i32 = arith.constant 0 : i32
    %c0_i32_0 = arith.constant 0 : i32
    %c0_i32_1 = arith.constant 0 : i32
    return %c0_i32, %c0_i32_0 : i32, i32
  }
  func.func @transform_2(%arg0: i32) -> (i32, i32) {
    %c0_i32 = arith.constant 0 : i32
    %c0_i32_0 = arith.constant 0 : i32
    %c0_i32_1 = arith.constant 0 : i32
    return %c0_i32, %c0_i32_0 : i32, i32
  }
  func.func @transform_3(%arg0: i32) -> (i32, i32) {
    %c0_i32 = arith.constant 0 : i32
    %c0_i32_0 = arith.constant 0 : i32
    %c0_i32_1 = arith.constant 0 : i32
    return %c0_i32, %c0_i32_0 : i32, i32
  }
  func.func @transform_4(%arg0: i32) -> (i32, i32) {
    %c0_i32 = arith.constant 0 : i32
    %c0_i32_0 = arith.constant 0 : i32
    %c0_i32_1 = arith.constant 0 : i32
    return %c0_i32, %c0_i32_0 : i32, i32
  }
  func.func @transform_5(%arg0: i32) -> (i32, i32) {
    %c0_i32 = arith.constant 0 : i32
    %c0_i32_0 = arith.constant 0 : i32
    %c0_i32_1 = arith.constant 0 : i32
    return %c0_i32, %c0_i32_0 : i32, i32
  }
  func.func @transform_6(%arg0: i32) -> (i32, i32) {
    %c0_i32 = arith.constant 0 : i32
    %c0_i32_0 = arith.constant 0 : i32
    %c0_i32_1 = arith.constant 0 : i32
    return %c0_i32, %c0_i32_0 : i32, i32
  }
  func.func @transform_7(%arg0: i32) -> (i32, i32) {
    %c0_i32 = arith.constant 0 : i32
    %c0_i32_0 = arith.constant 0 : i32
    return %arg0, %c0_i32 : i32, i32
  }
}

</mosaic_0001>

<bundles_post_ra>
// kernel: mlp_forward.1
= control target key start
LH: loop header
LB: loop body
LE: loop exit
PB: predicated region body
PF: predicated region fallthrough
CT: control target
= control target key end

     0   :  { %12 = vsyncpa [#allocation3], 0  ;;  %s4208_s0 = inlined_call_operand.vmem [shape: f32[8,784], index: 0, kind: input, shape index: {}]   ;;  %s4209_s1 = inlined_call_operand.hbm [shape: bf16[784,512], index: 1, kind: input, shape index: {}]   ;;  %s4210_s2 = inlined_call_operand.vmem [shape: f32[1,512], index: 2, kind: input, shape index: {}]   ;;  %s4211_s3 = inlined_call_operand.hbm [shape: bf16[512,512], index: 3, kind: input, shape index: {}]   ;;  %s4212_s4 = inlined_call_operand.vmem [shape: f32[1,512], index: 4, kind: input, shape index: {}]   ;;  %s4213_s5 = inlined_call_operand.vmem [shape: bf16[512,128], index: 5, kind: input, shape index: {}]   ;;  %s4214_s6 = inlined_call_operand.vmem [shape: f32[1,128], index: 6, kind: input, shape index: {}]   ;;  %s4215_s7 = inlined_call_operand.hbm [shape: f32[8,128], index: 7, kind: output, shape index: {}]  }
   0x1   :  { %13 = vsyncpa [#allocation6], 0 }
   0x2   :  { %14 = vsyncpa [#allocation4], 0  ;;  %s3969_s24 = smov [#allocation2]   ;;  %s3897_s28 = scalar_lea.hbm %s4209_s1, 25088 }
   0x3   :  { %s22_s25 = sshll.u32 %s3969_s24, 4  ;;  %p3898_p0 = scmp.ne.s32.totalorder %s4209_s1, %s3897_s28  ;;  %s23_s25 = int_to_ptr.vmem [resolvable:$true] %s22_s25 }
   0x4   :  { %p3901_p1 = scmp.lt.u32.totalorder %s3897_s28, %s4209_s1 }
   0x6   :  { %p3903_p2 = pnand %p3901_p1, %p3898_p0 }
   0x8   :  { %3906 = shalt.err (!%p3903_p2)
}
   0x9   :  { %s3907_s10 = scalar_lea.vmem %s23_s25, 25088  ;;  %p3912_p4 = scmp.lt.s32.totalorder %s23_s25, %s23_s25 }
   0xa   :  { %p3908_p3 = scmp.ne.s32.totalorder %s23_s25, %s3907_s10  ;;  %p3913_p5 = scmp.lt.s32.totalorder %s3907_s10, %s3907_s10 }
   0xc   :  { %p3914_p6 = por %p3913_p5, %p3912_p4 }
   0xe   :  { %p3915_p7 = pnand %p3914_p6, %p3908_p3 }
  0x10   :  { %3918 = shalt.err (!%p3915_p7)
}
  0x11   :  { %s3970_s11 = smov 256   ;;  %s3971_s12 = smov 16  }
  0x12   :  { %28 = dma.hbm_to_vmem [thread:$0]  %s4209_s1, 25088, %s23_s25, [#allocation3], %s3970_s11, %s3970_s11, %s3971_s12  }
  0x13   :  { %s3972_s15 = smov [#allocation5]   ;;  %s3919_s19 = scalar_lea.hbm %s4211_s3, 16384 }
  0x14   :  { %s36_s16 = sshll.u32 %s3972_s15, 4  ;;  %p3920_p8 = scmp.ne.s32.totalorder %s4211_s3, %s3919_s19  ;;  %s37_s16 = int_to_ptr.vmem [resolvable:$true] %s36_s16 }
  0x15   :  { %p3923_p9 = scmp.lt.u32.totalorder %s3919_s19, %s4211_s3 }
  0x17   :  { %p3925_p10 = pnand %p3923_p9, %p3920_p8 }
  0x19   :  { %3928 = shalt.err (!%p3925_p10)
}
  0x1a   :  { %s3929_s24 = scalar_lea.vmem %s37_s16, 16384  ;;  %p3934_p12 = scmp.lt.s32.totalorder %s37_s16, %s37_s16 }
  0x1b   :  { %p3930_p11 = scmp.ne.s32.totalorder %s37_s16, %s3929_s24  ;;  %p3935_p13 = scmp.lt.s32.totalorder %s3929_s24, %s3929_s24 }
  0x1d   :  { %p3936_p0 = por %p3935_p13, %p3934_p12 }
  0x1f   :  { %p3937_p1 = pnand %p3936_p0, %p3930_p11 }
  0x21   :  { %3940 = shalt.err (!%p3937_p1)
}
  0x22   :  { %42 = dma.hbm_to_vmem [thread:$0]  %s4211_s3, 16384, %s37_s16, [#allocation6], %s3970_s11, %s3970_s11, %s3971_s12  }
  0x23   :  { %3963 = dma.done.wait [#allocation3], 25088  }
  0x24   :  { %3964 = vsyncadd [#allocation3], 4294942208 }
  0x25   :  { %3965 = dma.done.wait [#allocation6], 16384  }
  0x26   :  { %3966 = vsyncadd [#allocation6], 4294950912  ;;  %v3379_v0 = vld [vmem:[#allocation2 + $0x4] ss:$16 sps:$4 sm:$0xff]   ;;  %v3381_v1 = vld [vmem:[#allocation2 + $0xc] ss:$16 sps:$4 sm:$0xff]  }
  0x27   :  { %1272 = vmatprep.subr.bf16.mxu0 %v3379_v0  ;;  %v3383_v2 = vld [vmem:[#allocation2] ss:$16 sps:$4 sm:$0xff]   ;;  %v3384_v3 = vld [vmem:[#allocation2 + $0x8] ss:$16 sps:$4 sm:$0xff]   ;;  %1436 = vmatprep.subr.bf16.mxu1 %v3381_v1  ;;  %v3385_v4 = vld [vmem:[#allocation2 + $0x24] ss:$16 sps:$4 sm:$0xff]  }
  0x28   :  { %1273 = vmatpush1.bf16.msra.mxu0 %v3383_v2  ;;  %1437 = vmatpush1.bf16.msra.mxu1 %v3384_v3  ;;  %v3387_v5 = vld [vmem:[#allocation2 + $0x2c] ss:$16 sps:$4 sm:$0xff]   ;;  %v3389_v6 = vld [vmem:[#allocation2 + $0x20] ss:$16 sps:$4 sm:$0xff]   ;;  %v3390_v7 = vld [vmem:[#allocation2 + $0x28] ss:$16 sps:$4 sm:$0xff]  }
  0x29   :  { %1274 = vmatprep.subr.bf16.mxu0 %v3385_v4  ;;  %1438 = vmatprep.subr.bf16.mxu1 %v3387_v5  ;;  %v3391_v8 = vld [vmem:[#allocation2 + $0x44] ss:$16 sps:$4 sm:$0xff]   ;;  %v3393_v9 = vld [vmem:[#allocation2 + $0x4c] ss:$16 sps:$4 sm:$0xff]   ;;  %v3395_v10 = vld [vmem:[#allocation2 + $0x40] ss:$16 sps:$4 sm:$0xff]  }
  0x2a   :  { %v3396_v11 = vld [vmem:[#allocation2 + $0x48] ss:$16 sps:$4 sm:$0xff]   ;;  %v3397_v12 = vld [vmem:[#allocation2 + $0x64] ss:$16 sps:$4 sm:$0xff]   ;;  %v3399_v13 = vld [vmem:[#allocation2 + $0x6c] ss:$16 sps:$4 sm:$0xff]  }
  0x2b   :  { %v3401_v14 = vld [vmem:[#allocation2 + $0x60] ss:$16 sps:$4 sm:$0xff]   ;;  %v3402_v15 = vld [vmem:[#allocation2 + $0x68] ss:$16 sps:$4 sm:$0xff]   ;;  %v3403_v16 = vld [vmem:[#allocation2 + $0x84] ss:$16 sps:$4 sm:$0xff]  }
  0x2c   :  { %1275 = vmatpush1.bf16.msra.mxu0 %v3389_v6  ;;  %1439 = vmatpush1.bf16.msra.mxu1 %v3390_v7  ;;  %v3405_v17 = vld [vmem:[#allocation2 + $0x8c] ss:$16 sps:$4 sm:$0xff]   ;;  %v3407_v18 = vld [vmem:[#allocation2 + $0x80] ss:$16 sps:$4 sm:$0xff]   ;;  %v3408_v19 = vld [vmem:[#allocation2 + $0x88] ss:$16 sps:$4 sm:$0xff]  }
  0x2d   :  { %1276 = vmatprep.subr.bf16.mxu0 %v3391_v8  ;;  %1440 = vmatprep.subr.bf16.mxu1 %v3393_v9  ;;  %v3409_v20 = vld [vmem:[#allocation2 + $0xa4] ss:$16 sps:$4 sm:$0xff]   ;;  %v3411_v21 = vld [vmem:[#allocation2 + $0xac] ss:$16 sps:$4 sm:$0xff]   ;;  %v3413_v22 = vld [vmem:[#allocation2 + $0xa0] ss:$16 sps:$4 sm:$0xff]  }
  0x2e   :  { %v3414_v23 = vld [vmem:[#allocation2 + $0xa8] ss:$16 sps:$4 sm:$0xff]   ;;  %v3415_v24 = vld [vmem:[#allocation2 + $0xc4] ss:$16 sps:$4 sm:$0xff]   ;;  %v3417_v25 = vld [vmem:[#allocation2 + $0xcc] ss:$16 sps:$4 sm:$0xff]  }
  0x2f   :  { %v3419_v26 = vld [vmem:[#allocation2 + $0xc0] ss:$16 sps:$4 sm:$0xff]   ;;  %v3420_v27 = vld [vmem:[#allocation2 + $0xc8] ss:$16 sps:$4 sm:$0xff]   ;;  %v3421_v28 = vld [vmem:[#allocation2 + $0xe4] ss:$16 sps:$4 sm:$0xff]  }
  0x30   :  { %1277 = vmatpush1.bf16.msra.mxu0 %v3395_v10  ;;  %1441 = vmatpush1.bf16.msra.mxu1 %v3396_v11  ;;  %v3423_v29 = vld [vmem:[#allocation2 + $0xec] ss:$16 sps:$4 sm:$0xff]   ;;  %v3425_v30 = vld [vmem:[#allocation2 + $0xe0] ss:$16 sps:$4 sm:$0xff]   ;;  %v3426_v31 = vld [vmem:[#allocation2 + $0xe8] ss:$16 sps:$4 sm:$0xff]  }
  0x31   :  { %1278 = vmatprep.subr.bf16.mxu0 %v3397_v12  ;;  %1442 = vmatprep.subr.bf16.mxu1 %v3399_v13  ;;  %v3427_v32 = vld [vmem:[#allocation2 + $0x104] ss:$16 sps:$4 sm:$0xff]   ;;  %v3429_v33 = vld [vmem:[#allocation2 + $0x10c] ss:$16 sps:$4 sm:$0xff]   ;;  %v3431_v34 = vld [vmem:[#allocation2 + $0x100] ss:$16 sps:$4 sm:$0xff]  }
  0x32   :  { %v3432_v35 = vld [vmem:[#allocation2 + $0x108] ss:$16 sps:$4 sm:$0xff]   ;;  %v3433_v36 = vld [vmem:[#allocation2 + $0x124] ss:$16 sps:$4 sm:$0xff]   ;;  %v3435_v37 = vld [vmem:[#allocation2 + $0x12c] ss:$16 sps:$4 sm:$0xff]  }
  0x33   :  { %v3437_v38 = vld [vmem:[#allocation2 + $0x120] ss:$16 sps:$4 sm:$0xff]   ;;  %v3438_v39 = vld [vmem:[#allocation2 + $0x128] ss:$16 sps:$4 sm:$0xff]   ;;  %v3439_v40 = vld [vmem:[#allocation2 + $0x144] ss:$16 sps:$4 sm:$0xff]  }
  0x34   :  { %1279 = vmatpush1.bf16.msra.mxu0 %v3401_v14  ;;  %1443 = vmatpush1.bf16.msra.mxu1 %v3402_v15  ;;  %v3441_v41 = vld [vmem:[#allocation2 + $0x14c] ss:$16 sps:$4 sm:$0xff]   ;;  %v3443_v42 = vld [vmem:[#allocation2 + $0x140] ss:$16 sps:$4 sm:$0xff]   ;;  %v3444_v43 = vld [vmem:[#allocation2 + $0x148] ss:$16 sps:$4 sm:$0xff]  }
  0x35   :  { %1280 = vmatprep.subr.bf16.mxu0 %v3403_v16  ;;  %1444 = vmatprep.subr.bf16.mxu1 %v3405_v17  ;;  %v3445_v44 = vld [vmem:[#allocation2 + $0x164] ss:$16 sps:$4 sm:$0xff]   ;;  %v3447_v45 = vld [vmem:[#allocation2 + $0x16c] ss:$16 sps:$4 sm:$0xff]   ;;  %v3449_v47 = vld [vmem:[#allocation2 + $0x160] ss:$16 sps:$4 sm:$0xff]  }
  0x36   :  { %v57_v46 = vld [vmem:[%s4208_s0 + $0x8] sm:$0xff]  ;;  %v3451_v50 = vld [vmem:[#allocation2 + $0x184] ss:$16 sps:$4 sm:$0xff]   ;;  %v3455_v52 = vld [vmem:[#allocation2 + $0x180] ss:$16 sps:$4 sm:$0xff]   ;;  %vm1268_vm0 = vcmask 130048  }
  0x37   :  { %v64_v48 = vpack.c.bf16 %v57_v46, %v57_v46  ;;  %v3450_v49 = vld [vmem:[#allocation2 + $0x168] ss:$16 sps:$4 sm:$0xff]   ;;  %v3453_v51 = vld [vmem:[#allocation2 + $0x18c] ss:$16 sps:$4 sm:$0xff]   ;;  %v3457_v54 = vld [vmem:[#allocation2 + $0x1a4] ss:$16 sps:$4 sm:$0xff]  }
  0x38   :  { %1281 = vmatpush1.bf16.msra.mxu0 %v3407_v18  ;;  %1445 = vmatpush1.bf16.msra.mxu1 %v3408_v19  ;;  %v3456_v53 = vld [vmem:[#allocation2 + $0x188] ss:$16 sps:$4 sm:$0xff]   ;;  %v3459_v55 = vld [vmem:[#allocation2 + $0x1ac] ss:$16 sps:$4 sm:$0xff]   ;;  %v3461_v56 = vld [vmem:[#allocation2 + $0x1a0] ss:$16 sps:$4 sm:$0xff]  }
  0x39   :  { %1282 = vmatprep.subr.bf16.mxu0 %v3409_v20  ;;  %1446 = vmatprep.subr.bf16.mxu1 %v3411_v21  ;;  %v3462_v57 = vld [vmem:[#allocation2 + $0x1a8] ss:$16 sps:$4 sm:$0xff]   ;;  %v3463_v58 = vld [vmem:[#allocation2 + $0x1c4] ss:$16 sps:$4 sm:$0xff]   ;;  %v3465_v59 = vld [vmem:[#allocation2 + $0x1cc] ss:$16 sps:$4 sm:$0xff]  }
  0x3a   :  { %1304 = vmatprep.mubr.bf16.mxu0 %v64_v48  ;;  %1468 = vmatprep.mubr.bf16.mxu1 %v64_v48  ;;  %v3467_v60 = vld [vmem:[#allocation2 + $0x1c0] ss:$16 sps:$4 sm:$0xff]   ;;  %v3468_v61 = vld [vmem:[#allocation2 + $0x1c8] ss:$16 sps:$4 sm:$0xff]   ;;  %v3469_v62 = vld [vmem:[#allocation2 + $0x1e4] ss:$16 sps:$4 sm:$0xff]  }
  0x3b   :  { %v3471_v63 = vld [vmem:[#allocation2 + $0x1ec] ss:$16 sps:$4 sm:$0xff]   ;;  %v3473_v0 = vld [vmem:[#allocation2 + $0x1e0] ss:$16 sps:$4 sm:$0xff]   ;;  %v3474_v1 = vld [vmem:[#allocation2 + $0x1e8] ss:$16 sps:$4 sm:$0xff]  }
  0x3c   :  { %1283 = vmatpush1.bf16.msra.mxu0 %v3413_v22  ;;  %1447 = vmatpush1.bf16.msra.mxu1 %v3414_v23  ;;  %v56_v2 = vld [vmem:[%s4208_s0] sm:$0xff]  ;;  %v3480_v4 = vld [vmem:[#allocation2 + $0x20c] ss:$16 sps:$4 sm:$0xff]   ;;  %v3478_v7 = vld [vmem:[#allocation2 + $0x208] ss:$16 sps:$4 sm:$0xff]   ;;  %s3974_s26 = smov [#allocation7]  }
  0x3d   :  { %1284 = vmatprep.subr.bf16.mxu0 %v3415_v24  ;;  %1448 = vmatprep.subr.bf16.mxu1 %v3417_v25  ;;  %v3477_v3 = vld [vmem:[#allocation2 + $0x204] ss:$16 sps:$4 sm:$0xff]   ;;  %v63_v5 = vpack.c.bf16 %v56_v2, %v56_v2  ;;  %v3475_v6 = vld [vmem:[#allocation2 + $0x200] ss:$16 sps:$4 sm:$0xff]   ;;  %v3486_v9 = vld [vmem:[#allocation2 + $0x22c] ss:$16 sps:$4 sm:$0xff]  }
  0x3e   :  { %v3483_v8 = vld [vmem:[#allocation2 + $0x224] ss:$16 sps:$4 sm:$0xff]   ;;  %v3481_v10 = vld [vmem:[#allocation2 + $0x220] ss:$16 sps:$4 sm:$0xff]   ;;  %v3484_v11 = vld [vmem:[#allocation2 + $0x228] ss:$16 sps:$4 sm:$0xff]  }
  0x3f   :  { %v3489_v12 = vld [vmem:[#allocation2 + $0x244] ss:$16 sps:$4 sm:$0xff]   ;;  %v3492_v13 = vld [vmem:[#allocation2 + $0x24c] ss:$16 sps:$4 sm:$0xff]   ;;  %v3487_v14 = vld [vmem:[#allocation2 + $0x240] ss:$16 sps:$4 sm:$0xff]  }
  0x40   :  { %1285 = vmatpush1.bf16.msra.mxu0 %v3419_v26  ;;  %1449 = vmatpush1.bf16.msra.mxu1 %v3420_v27  ;;  %v3490_v15 = vld [vmem:[#allocation2 + $0x248] ss:$16 sps:$4 sm:$0xff]   ;;  %v3495_v16 = vld [vmem:[#allocation2 + $0x264] ss:$16 sps:$4 sm:$0xff]   ;;  %v3498_v17 = vld [vmem:[#allocation2 + $0x26c] ss:$16 sps:$4 sm:$0xff]  }
  0x41   :  { %1286 = vmatprep.subr.bf16.mxu0 %v3421_v28  ;;  %1450 = vmatprep.subr.bf16.mxu1 %v3423_v29  ;;  %v3493_v18 = vld [vmem:[#allocation2 + $0x260] ss:$16 sps:$4 sm:$0xff]   ;;  %v3496_v19 = vld [vmem:[#allocation2 + $0x268] ss:$16 sps:$4 sm:$0xff]   ;;  %v3501_v20 = vld [vmem:[#allocation2 + $0x284] ss:$16 sps:$4 sm:$0xff]  }
  0x42   :  { %v3504_v21 = vld [vmem:[#allocation2 + $0x28c] ss:$16 sps:$4 sm:$0xff]   ;;  %v3499_v22 = vld [vmem:[#allocation2 + $0x280] ss:$16 sps:$4 sm:$0xff]   ;;  %v3502_v23 = vld [vmem:[#allocation2 + $0x288] ss:$16 sps:$4 sm:$0xff]  }
  0x43   :  { %v3507_v24 = vld [vmem:[#allocation2 + $0x2a4] ss:$16 sps:$4 sm:$0xff]   ;;  %v3510_v25 = vld [vmem:[#allocation2 + $0x2ac] ss:$16 sps:$4 sm:$0xff]   ;;  %v3505_v26 = vld [vmem:[#allocation2 + $0x2a0] ss:$16 sps:$4 sm:$0xff]  }
  0x44   :  { %1287 = vmatpush1.bf16.msra.mxu0 %v3425_v30  ;;  %1451 = vmatpush1.bf16.msra.mxu1 %v3426_v31  ;;  %v3508_v27 = vld [vmem:[#allocation2 + $0x2a8] ss:$16 sps:$4 sm:$0xff]   ;;  %v3513_v28 = vld [vmem:[#allocation2 + $0x2c4] ss:$16 sps:$4 sm:$0xff]   ;;  %v3516_v29 = vld [vmem:[#allocation2 + $0x2cc] ss:$16 sps:$4 sm:$0xff]  }
  0x45   :  { %1288 = vmatprep.subr.bf16.mxu0 %v3427_v32  ;;  %1452 = vmatprep.subr.bf16.mxu1 %v3429_v33  ;;  %v59_v30 = vld [vmem:[%s4208_s0 + $0x18] sm:$0xff]  ;;  %v3511_v31 = vld [vmem:[#allocation2 + $0x2c0] ss:$16 sps:$4 sm:$0xff]   ;;  %v3537_v46 = vld [vmem:[#allocation2 + $0x344] ss:$16 sps:$4 sm:$0xff]   ;;  %s2920_s27 = sshll.u32 %s3974_s26, 4  ;;  %s2921_s27 = int_to_ptr.vmem [resolvable:$true] %s2920_s27 }
  0x46   :  { %v66_v32 = vpack.c.bf16 %v59_v30, %v59_v30  ;;  %v3514_v33 = vld [vmem:[#allocation2 + $0x2c8] ss:$16 sps:$4 sm:$0xff]   ;;  %v3535_v48 = vld [vmem:[#allocation2 + $0x340] ss:$16 sps:$4 sm:$0xff]   ;;  %v3567_v2 = vld [vmem:[#allocation2 + $0x3e4] ss:$16 sps:$4 sm:$0xff]   ;;  %p3946_p3 = scmp.lt.s32.totalorder %s2921_s27, %s2921_s27 }
  0x47   :  { %v3603_v30 = vld [vmem:[#allocation2 + $0x4a4] ss:$16 sps:$4 sm:$0xff]   ;;  %s3941_s28 = scalar_lea.vmem %s2921_s27, 128 }
  0x48   :  { %1289 = vmatpush1.bf16.msra.mxu0 %v3431_v34  ;;  %1453 = vmatpush1.bf16.msra.mxu1 %v3432_v35  ;;  %v3519_v34 = vld [vmem:[#allocation2 + $0x2e4] ss:$16 sps:$4 sm:$0xff]   ;;  %v3522_v35 = vld [vmem:[#allocation2 + $0x2ec] ss:$16 sps:$4 sm:$0xff]   ;;  %p3942_p2 = scmp.ne.s32.totalorder %s2921_s27, %s3941_s28  ;;  %p3947_p4 = scmp.lt.s32.totalorder %s3941_s28, %s3941_s28 }
  0x49   :  { %1290 = vmatprep.subr.bf16.mxu0 %v3433_v36  ;;  %1454 = vmatprep.subr.bf16.mxu1 %v3435_v37  ;;  %v3517_v36 = vld [vmem:[#allocation2 + $0x2e0] ss:$16 sps:$4 sm:$0xff]   ;;  %v3520_v37 = vld [vmem:[#allocation2 + $0x2e8] ss:$16 sps:$4 sm:$0xff]  }
  0x4a   :  { %p3948_p5 = por %p3947_p4, %p3946_p3 }
  0x4c   :  { %1291 = vmatpush1.bf16.msra.mxu0 %v3437_v38  ;;  %1455 = vmatpush1.bf16.msra.mxu1 %v3438_v39  ;;  %v3525_v38 = vld [vmem:[#allocation2 + $0x304] ss:$16 sps:$4 sm:$0xff]   ;;  %v3528_v39 = vld [vmem:[#allocation2 + $0x30c] ss:$16 sps:$4 sm:$0xff]   ;;  %p3949_p6 = pnand %p3948_p5, %p3942_p2 }
  0x4d   :  { %1292 = vmatprep.subr.bf16.mxu0 %v3439_v40  ;;  %1456 = vmatprep.subr.bf16.mxu1 %v3441_v41  ;;  %v3523_v40 = vld [vmem:[#allocation2 + $0x300] ss:$16 sps:$4 sm:$0xff]   ;;  %v3526_v41 = vld [vmem:[#allocation2 + $0x308] ss:$16 sps:$4 sm:$0xff]  }
  0x50   :  { %1293 = vmatpush1.bf16.msra.mxu0 %v3443_v42  ;;  %1457 = vmatpush1.bf16.msra.mxu1 %v3444_v43  ;;  %v3531_v42 = vld [vmem:[#allocation2 + $0x324] ss:$16 sps:$4 sm:$0xff]   ;;  %v3534_v43 = vld [vmem:[#allocation2 + $0x32c] ss:$16 sps:$4 sm:$0xff]  }
  0x51   :  { %1294 = vmatprep.subr.bf16.mxu0 %v3445_v44  ;;  %1458 = vmatprep.subr.bf16.mxu1 %v3447_v45  ;;  %v3529_v44 = vld [vmem:[#allocation2 + $0x320] ss:$16 sps:$4 sm:$0xff]   ;;  %v3532_v45 = vld [vmem:[#allocation2 + $0x328] ss:$16 sps:$4 sm:$0xff]  }
  0x54   :  { %1295 = vmatpush1.bf16.msra.mxu0 %v3449_v47  ;;  %1459 = vmatpush1.bf16.msra.mxu1 %v3450_v49  ;;  %v3540_v47 = vld [vmem:[#allocation2 + $0x34c] ss:$16 sps:$4 sm:$0xff]   ;;  %v3538_v49 = vld [vmem:[#allocation2 + $0x348] ss:$16 sps:$4 sm:$0xff]  }
  0x55   :  { %1296 = vmatprep.subr.bf16.mxu0 %v3451_v50  ;;  %1460 = vmatprep.subr.bf16.mxu1 %v3453_v51  ;;  %v3543_v50 = vld [vmem:[#allocation2 + $0x364] ss:$16 sps:$4 sm:$0xff]   ;;  %v3546_v51 = vld [vmem:[#allocation2 + $0x36c] ss:$16 sps:$4 sm:$0xff]  }
  0x58   :  { %1297 = vmatpush1.bf16.msra.mxu0 %v3455_v52  ;;  %1461 = vmatpush1.bf16.msra.mxu1 %v3456_v53  ;;  %v3541_v52 = vld [vmem:[#allocation2 + $0x360] ss:$16 sps:$4 sm:$0xff]   ;;  %v3544_v53 = vld [vmem:[#allocation2 + $0x368] ss:$16 sps:$4 sm:$0xff]  }
  0x59   :  { %1298 = vmatprep.subr.bf16.mxu0 %v3457_v54  ;;  %1462 = vmatprep.subr.bf16.mxu1 %v3459_v55  ;;  %v3549_v54 = vld [vmem:[#allocation2 + $0x384] ss:$16 sps:$4 sm:$0xff]   ;;  %v3552_v55 = vld [vmem:[#allocation2 + $0x38c] ss:$16 sps:$4 sm:$0xff]  }
  0x5c   :  { %1299 = vmatpush1.bf16.msra.mxu0 %v3461_v56  ;;  %1463 = vmatpush1.bf16.msra.mxu1 %v3462_v57  ;;  %v3547_v56 = vld [vmem:[#allocation2 + $0x380] ss:$16 sps:$4 sm:$0xff]   ;;  %v3550_v57 = vld [vmem:[#allocation2 + $0x388] ss:$16 sps:$4 sm:$0xff]  }
  0x5d   :  { %1300 = vmatprep.subr.bf16.mxu0 %v3463_v58  ;;  %1464 = vmatprep.subr.bf16.mxu1 %v3465_v59  ;;  %v3555_v58 = vld [vmem:[#allocation2 + $0x3a4] ss:$16 sps:$4 sm:$0xff]   ;;  %v3558_v59 = vld [vmem:[#allocation2 + $0x3ac] ss:$16 sps:$4 sm:$0xff]  }
  0x60   :  { %1301 = vmatpush1.bf16.msra.mxu0 %v3467_v60  ;;  %1465 = vmatpush1.bf16.msra.mxu1 %v3468_v61  ;;  %v3553_v60 = vld [vmem:[#allocation2 + $0x3a0] ss:$16 sps:$4 sm:$0xff]   ;;  %v3556_v61 = vld [vmem:[#allocation2 + $0x3a8] ss:$16 sps:$4 sm:$0xff]  }
  0x61   :  { %1302 = vmatprep.subr.bf16.mxu0 %v3469_v62  ;;  %1466 = vmatprep.subr.bf16.mxu1 %v3471_v63  ;;  %v3561_v62 = vld [vmem:[#allocation2 + $0x3c4] ss:$16 sps:$4 sm:$0xff]   ;;  %v3564_v63 = vld [vmem:[#allocation2 + $0x3cc] ss:$16 sps:$4 sm:$0xff]  }
  0x64   :  { %1303 = vmatpush1.bf16.msra.mxu0 %v3473_v0  ;;  %1467 = vmatpush1.bf16.msra.mxu1 %v3474_v1  ;;  %v3559_v0 = vld [vmem:[#allocation2 + $0x3c0] ss:$16 sps:$4 sm:$0xff]   ;;  %v3562_v1 = vld [vmem:[#allocation2 + $0x3c8] ss:$16 sps:$4 sm:$0xff]  }
  0x65   :  { %1313 = vmatprep.subr.bf16.mxu0 %v3477_v3  ;;  %1477 = vmatprep.subr.bf16.mxu1 %v3480_v4  ;;  %v3570_v3 = vld [vmem:[#allocation2 + $0x3ec] ss:$16 sps:$4 sm:$0xff]   ;;  %v3565_v4 = vld [vmem:[#allocation2 + $0x3e0] ss:$16 sps:$4 sm:$0xff]  }
  0x67   :  { %1305 = vmatmul.mubr.bf16.vlgmr.msra.gmra.mrb[0].mxu0 %v63_v5  ;;  %1469 = vmatmul.mubr.bf16.vlgmr.msra.gmra.mrb[0].mxu1 %v63_v5  ;;  %v3568_v5 = vld [vmem:[#allocation2 + $0x3e8] ss:$16 sps:$4 sm:$0xff]  }
  0x68   :  { %1314 = vmatpush1.bf16.msra.mxu0 %v3475_v6  ;;  %1478 = vmatpush1.bf16.msra.mxu1 %v3478_v7  ;;  %v3573_v6 = vld [vmem:[#allocation2 + $0x404] ss:$16 sps:$4 sm:$0xff]  }
  0x69   :  { %1315 = vmatprep.subr.bf16.mxu0 %v3483_v8  ;;  %1479 = vmatprep.subr.bf16.mxu1 %v3486_v9  ;;  %v58_v7 = vld [vmem:[%s4208_s0 + $0x10] sm:$0xff]  ;;  %v3576_v8 = vld [vmem:[#allocation2 + $0x40c] ss:$16 sps:$4 sm:$0xff]  }
  0x6a   :  { %1345 = vmatprep.mubr.bf16.mxu0 %v66_v32  ;;  %1509 = vmatprep.mubr.bf16.mxu1 %v66_v32  ;;  %v3571_v9 = vld [vmem:[#allocation2 + $0x400] ss:$16 sps:$4 sm:$0xff]  }
  0x6b   :  { %v3601_v32 = vld [vmem:[#allocation2 + $0x4a0] ss:$16 sps:$4 sm:$0xff]  }
  0x6c   :  { %1316 = vmatpush1.bf16.msra.mxu0 %v3481_v10  ;;  %1480 = vmatpush1.bf16.msra.mxu1 %v3484_v11  ;;  %v65_v10 = vpack.c.bf16 %v58_v7, %v58_v7  ;;  %v3574_v11 = vld [vmem:[#allocation2 + $0x408] ss:$16 sps:$4 sm:$0xff]   ;;  %v3666_v7 = vld [vmem:[#allocation2 + $0x5ec] ss:$16 sps:$4 sm:$0xff]  }
  0x6d   :  { %1317 = vmatprep.subr.bf16.mxu0 %v3489_v12  ;;  %1481 = vmatprep.subr.bf16.mxu1 %v3492_v13  ;;  %v3579_v12 = vld [vmem:[#allocation2 + $0x424] ss:$16 sps:$4 sm:$0xff]   ;;  %v3582_v13 = vld [vmem:[#allocation2 + $0x42c] ss:$16 sps:$4 sm:$0xff]  }
  0x70   :  { %1318 = vmatpush1.bf16.msra.mxu0 %v3487_v14  ;;  %1482 = vmatpush1.bf16.msra.mxu1 %v3490_v15  ;;  %v61_v14 = vld [vmem:[%s4208_s0 + $0x28] sm:$0xff] }
  0x71   :  { %1319 = vmatprep.subr.bf16.mxu0 %v3495_v16  ;;  %1483 = vmatprep.subr.bf16.mxu1 %v3498_v17  ;;  %v68_v15 = vpack.c.bf16 %v61_v14, %v61_v14  ;;  %v3577_v16 = vld [vmem:[#allocation2 + $0x420] ss:$16 sps:$4 sm:$0xff]   ;;  %v3580_v17 = vld [vmem:[#allocation2 + $0x428] ss:$16 sps:$4 sm:$0xff]  }
  0x72   :  { %v3670_v14 = vld [vmem:[#allocation2 + $0x608] ss:$16 sps:$4 sm:$0xff]  }
  0x74   :  { %1320 = vmatpush1.bf16.msra.mxu0 %v3493_v18  ;;  %1484 = vmatpush1.bf16.msra.mxu1 %v3496_v19  ;;  %v3585_v18 = vld [vmem:[#allocation2 + $0x444] ss:$16 sps:$4 sm:$0xff]   ;;  %v3588_v19 = vld [vmem:[#allocation2 + $0x44c] ss:$16 sps:$4 sm:$0xff]  }
  0x75   :  { %1321 = vmatprep.subr.bf16.mxu0 %v3501_v20  ;;  %1485 = vmatprep.subr.bf16.mxu1 %v3504_v21  ;;  %v3583_v20 = vld [vmem:[#allocation2 + $0x440] ss:$16 sps:$4 sm:$0xff]   ;;  %v3586_v21 = vld [vmem:[#allocation2 + $0x448] ss:$16 sps:$4 sm:$0xff]  }
  0x78   :  { %1322 = vmatpush1.bf16.msra.mxu0 %v3499_v22  ;;  %1486 = vmatpush1.bf16.msra.mxu1 %v3502_v23  ;;  %v3591_v22 = vld [vmem:[#allocation2 + $0x464] ss:$16 sps:$4 sm:$0xff]   ;;  %v3594_v23 = vld [vmem:[#allocation2 + $0x46c] ss:$16 sps:$4 sm:$0xff]  }
  0x79   :  { %1323 = vmatprep.subr.bf16.mxu0 %v3507_v24  ;;  %1487 = vmatprep.subr.bf16.mxu1 %v3510_v25  ;;  %v3589_v24 = vld [vmem:[#allocation2 + $0x460] ss:$16 sps:$4 sm:$0xff]   ;;  %v3592_v25 = vld [vmem:[#allocation2 + $0x468] ss:$16 sps:$4 sm:$0xff]  }
  0x7c   :  { %1324 = vmatpush1.bf16.msra.mxu0 %v3505_v26  ;;  %1488 = vmatpush1.bf16.msra.mxu1 %v3508_v27  ;;  %v3597_v26 = vld [vmem:[#allocation2 + $0x484] ss:$16 sps:$4 sm:$0xff]   ;;  %v3600_v27 = vld [vmem:[#allocation2 + $0x48c] ss:$16 sps:$4 sm:$0xff]  }
  0x7d   :  { %1325 = vmatprep.subr.bf16.mxu0 %v3513_v28  ;;  %1489 = vmatprep.subr.bf16.mxu1 %v3516_v29  ;;  %v3595_v28 = vld [vmem:[#allocation2 + $0x480] ss:$16 sps:$4 sm:$0xff]   ;;  %v3598_v29 = vld [vmem:[#allocation2 + $0x488] ss:$16 sps:$4 sm:$0xff]  }
  0x80   :  { %1326 = vmatpush1.bf16.msra.mxu0 %v3511_v31  ;;  %1490 = vmatpush1.bf16.msra.mxu1 %v3514_v33  ;;  %v3606_v31 = vld [vmem:[#allocation2 + $0x4ac] ss:$16 sps:$4 sm:$0xff]   ;;  %v3604_v33 = vld [vmem:[#allocation2 + $0x4a8] ss:$16 sps:$4 sm:$0xff]  }
  0x81   :  { %1327 = vmatprep.subr.bf16.mxu0 %v3519_v34  ;;  %1491 = vmatprep.subr.bf16.mxu1 %v3522_v35  ;;  %v3609_v34 = vld [vmem:[#allocation2 + $0x4c4] ss:$16 sps:$4 sm:$0xff]   ;;  %v3612_v35 = vld [vmem:[#allocation2 + $0x4cc] ss:$16 sps:$4 sm:$0xff]  }
  0x84   :  { %1328 = vmatpush1.bf16.msra.mxu0 %v3517_v36  ;;  %1492 = vmatpush1.bf16.msra.mxu1 %v3520_v37  ;;  %v3607_v36 = vld [vmem:[#allocation2 + $0x4c0] ss:$16 sps:$4 sm:$0xff]   ;;  %v3610_v37 = vld [vmem:[#allocation2 + $0x4c8] ss:$16 sps:$4 sm:$0xff]  }
  0x85   :  { %1329 = vmatprep.subr.bf16.mxu0 %v3525_v38  ;;  %1493 = vmatprep.subr.bf16.mxu1 %v3528_v39  ;;  %v3615_v38 = vld [vmem:[#allocation2 + $0x4e4] ss:$16 sps:$4 sm:$0xff]   ;;  %v3618_v39 = vld [vmem:[#allocation2 + $0x4ec] ss:$16 sps:$4 sm:$0xff]  }
  0x88   :  { %1330 = vmatpush1.bf16.msra.mxu0 %v3523_v40  ;;  %1494 = vmatpush1.bf16.msra.mxu1 %v3526_v41  ;;  %v3613_v40 = vld [vmem:[#allocation2 + $0x4e0] ss:$16 sps:$4 sm:$0xff]   ;;  %v3616_v41 = vld [vmem:[#allocation2 + $0x4e8] ss:$16 sps:$4 sm:$0xff]  }
  0x89   :  { %1331 = vmatprep.subr.bf16.mxu0 %v3531_v42  ;;  %1495 = vmatprep.subr.bf16.mxu1 %v3534_v43  ;;  %v3621_v42 = vld [vmem:[#allocation2 + $0x504] ss:$16 sps:$4 sm:$0xff]   ;;  %v3624_v43 = vld [vmem:[#allocation2 + $0x50c] ss:$16 sps:$4 sm:$0xff]  }
  0x8c   :  { %1332 = vmatpush1.bf16.msra.mxu0 %v3529_v44  ;;  %1496 = vmatpush1.bf16.msra.mxu1 %v3532_v45  ;;  %v3619_v44 = vld [vmem:[#allocation2 + $0x500] ss:$16 sps:$4 sm:$0xff]   ;;  %v3622_v45 = vld [vmem:[#allocation2 + $0x508] ss:$16 sps:$4 sm:$0xff]  }
  0x8d   :  { %1333 = vmatprep.subr.bf16.mxu0 %v3537_v46  ;;  %1497 = vmatprep.subr.bf16.mxu1 %v3540_v47  ;;  %v3627_v46 = vld [vmem:[#allocation2 + $0x524] ss:$16 sps:$4 sm:$0xff]   ;;  %v3630_v47 = vld [vmem:[#allocation2 + $0x52c] ss:$16 sps:$4 sm:$0xff]  }
  0x90   :  { %1334 = vmatpush1.bf16.msra.mxu0 %v3535_v48  ;;  %1498 = vmatpush1.bf16.msra.mxu1 %v3538_v49  ;;  %v3625_v48 = vld [vmem:[#allocation2 + $0x520] ss:$16 sps:$4 sm:$0xff]   ;;  %v3628_v49 = vld [vmem:[#allocation2 + $0x528] ss:$16 sps:$4 sm:$0xff]  }
  0x91   :  { %1335 = vmatprep.subr.bf16.mxu0 %v3543_v50  ;;  %1499 = vmatprep.subr.bf16.mxu1 %v3546_v51  ;;  %v3633_v50 = vld [vmem:[#allocation2 + $0x544] ss:$16 sps:$4 sm:$0xff]   ;;  %v3636_v51 = vld [vmem:[#allocation2 + $0x54c] ss:$16 sps:$4 sm:$0xff]  }
  0x94   :  { %1336 = vmatpush1.bf16.msra.mxu0 %v3541_v52  ;;  %1500 = vmatpush1.bf16.msra.mxu1 %v3544_v53  ;;  %v3631_v52 = vld [vmem:[#allocation2 + $0x540] ss:$16 sps:$4 sm:$0xff]   ;;  %v3634_v53 = vld [vmem:[#allocation2 + $0x548] ss:$16 sps:$4 sm:$0xff]  }
  0x95   :  { %1337 = vmatprep.subr.bf16.mxu0 %v3549_v54  ;;  %1501 = vmatprep.subr.bf16.mxu1 %v3552_v55  ;;  %v3639_v54 = vld [vmem:[#allocation2 + $0x564] ss:$16 sps:$4 sm:$0xff]   ;;  %v3642_v55 = vld [vmem:[#allocation2 + $0x56c] ss:$16 sps:$4 sm:$0xff]  }
  0x98   :  { %1338 = vmatpush1.bf16.msra.mxu0 %v3547_v56  ;;  %1502 = vmatpush1.bf16.msra.mxu1 %v3550_v57  ;;  %v3637_v56 = vld [vmem:[#allocation2 + $0x560] ss:$16 sps:$4 sm:$0xff]   ;;  %v3640_v57 = vld [vmem:[#allocation2 + $0x568] ss:$16 sps:$4 sm:$0xff]  }
  0x99   :  { %1339 = vmatprep.subr.bf16.mxu0 %v3555_v58  ;;  %1503 = vmatprep.subr.bf16.mxu1 %v3558_v59  ;;  %v3645_v58 = vld [vmem:[#allocation2 + $0x584] ss:$16 sps:$4 sm:$0xff]   ;;  %v3648_v59 = vld [vmem:[#allocation2 + $0x58c] ss:$16 sps:$4 sm:$0xff]  }
  0x9c   :  { %1340 = vmatpush1.bf16.msra.mxu0 %v3553_v60  ;;  %1504 = vmatpush1.bf16.msra.mxu1 %v3556_v61  ;;  %v3643_v60 = vld [vmem:[#allocation2 + $0x580] ss:$16 sps:$4 sm:$0xff]   ;;  %v3646_v61 = vld [vmem:[#allocation2 + $0x588] ss:$16 sps:$4 sm:$0xff]  }
  0x9d   :  { %1341 = vmatprep.subr.bf16.mxu0 %v3561_v62  ;;  %1505 = vmatprep.subr.bf16.mxu1 %v3564_v63  ;;  %v3651_v62 = vld [vmem:[#allocation2 + $0x5a4] ss:$16 sps:$4 sm:$0xff]   ;;  %v3654_v63 = vld [vmem:[#allocation2 + $0x5ac] ss:$16 sps:$4 sm:$0xff]  }
  0xa0   :  { %1342 = vmatpush1.bf16.msra.mxu0 %v3559_v0  ;;  %1506 = vmatpush1.bf16.msra.mxu1 %v3562_v1  ;;  %v3649_v0 = vld [vmem:[#allocation2 + $0x5a0] ss:$16 sps:$4 sm:$0xff]   ;;  %v3652_v1 = vld [vmem:[#allocation2 + $0x5a8] ss:$16 sps:$4 sm:$0xff]  }
  0xa1   :  { %1343 = vmatprep.subr.bf16.mxu0 %v3567_v2  ;;  %1507 = vmatprep.subr.bf16.mxu1 %v3570_v3  ;;  %v3657_v2 = vld [vmem:[#allocation2 + $0x5c4] ss:$16 sps:$4 sm:$0xff]   ;;  %v3660_v3 = vld [vmem:[#allocation2 + $0x5cc] ss:$16 sps:$4 sm:$0xff]  }
  0xa4   :  { %1344 = vmatpush1.bf16.msra.mxu0 %v3565_v4  ;;  %1508 = vmatpush1.bf16.msra.mxu1 %v3568_v5  ;;  %v3655_v4 = vld [vmem:[#allocation2 + $0x5c0] ss:$16 sps:$4 sm:$0xff]   ;;  %v3658_v5 = vld [vmem:[#allocation2 + $0x5c8] ss:$16 sps:$4 sm:$0xff]  }
  0xa5   :  { %1354 = vmatprep.subr.bf16.mxu0 %v3573_v6  ;;  %1518 = vmatprep.subr.bf16.mxu1 %v3576_v8  ;;  %v3663_v6 = vld [vmem:[#allocation2 + $0x5e4] ss:$16 sps:$4 sm:$0xff]   ;;  %v3661_v8 = vld [vmem:[#allocation2 + $0x5e0] ss:$16 sps:$4 sm:$0xff]  }
  0xa7   :  { %1346 = vmatmul.mubr.bf16.vlgmr.msra.gmra.mrb[0].mxu0 %v65_v10  ;;  %1510 = vmatmul.mubr.bf16.vlgmr.msra.gmra.mrb[0].mxu1 %v65_v10  ;;  %v60_v10 = vld [vmem:[%s4208_s0 + $0x20] sm:$0xff] }
  0xa8   :  { %1355 = vmatpush1.bf16.msra.mxu0 %v3571_v9  ;;  %1519 = vmatpush1.bf16.msra.mxu1 %v3574_v11  ;;  %v3664_v9 = vld [vmem:[#allocation2 + $0x5e8] ss:$16 sps:$4 sm:$0xff]   ;;  %v3669_v11 = vld [vmem:[#allocation2 + $0x604] ss:$16 sps:$4 sm:$0xff]  }
  0xa9   :  { %1356 = vmatprep.subr.bf16.mxu0 %v3579_v12  ;;  %1520 = vmatprep.subr.bf16.mxu1 %v3582_v13  ;;  %v3672_v12 = vld [vmem:[#allocation2 + $0x60c] ss:$16 sps:$4 sm:$0xff]   ;;  %v3667_v13 = vld [vmem:[#allocation2 + $0x600] ss:$16 sps:$4 sm:$0xff]  }
  0xaa   :  { %1386 = vmatprep.mubr.bf16.mxu0 %v68_v15  ;;  %1550 = vmatprep.mubr.bf16.mxu1 %v68_v15  ;;  %v67_v15 = vpack.c.bf16 %v60_v10, %v60_v10  ;;  %v3754_v10 = vld [vmem:[#allocation5 + $0x1a8] ss:$16 sps:$4 sm:$0xff]  }
  0xac   :  { %1357 = vmatpush1.bf16.msra.mxu0 %v3577_v16  ;;  %1521 = vmatpush1.bf16.msra.mxu1 %v3580_v17  ;;  %v3675_v16 = vld [vmem:[#allocation5 + $0x4] ss:$16 sps:$4 sm:$0xff]   ;;  %v3678_v17 = vld [vmem:[#allocation5 + $0xc] ss:$16 sps:$4 sm:$0xff]  }
  0xad   :  { %1358 = vmatprep.subr.bf16.mxu0 %v3585_v18  ;;  %1522 = vmatprep.subr.bf16.mxu1 %v3588_v19  ;;  %v3973_v18 = vmov 0   ;;  %v62_v19 = vld [vmem:[%s4208_s0 + $0x30] sm:$0xff] }
  0xb0   :  { %1359 = vmatpush1.bf16.msra.mxu0 %v3583_v20  ;;  %1523 = vmatpush1.bf16.msra.mxu1 %v3586_v21  ;;  %v3673_v20 = vld [vmem:[#allocation5] ss:$16 sps:$4 sm:$0xff]   ;;  %v3676_v21 = vld [vmem:[#allocation5 + $0x8] ss:$16 sps:$4 sm:$0xff]  }
  0xb1   :  { %1360 = vmatprep.subr.bf16.mxu0 %v3591_v22  ;;  %1524 = vmatprep.subr.bf16.mxu1 %v3594_v23  ;;  %v69_v22 = vpack.c.bf16 %v62_v19, %v62_v19  ;;  %v3681_v23 = vld [vmem:[#allocation5 + $0x24] ss:$16 sps:$4 sm:$0xff]  }
  0xb2   :  { %v3771_v19 = vld [vmem:[#allocation5 + $0x204] ss:$16 sps:$4 sm:$0xff]  }
  0xb4   :  { %1361 = vmatpush1.bf16.msra.mxu0 %v3589_v24  ;;  %1525 = vmatpush1.bf16.msra.mxu1 %v3592_v25  ;;  %v3684_v24 = vld [vmem:[#allocation5 + $0x2c] ss:$16 sps:$4 sm:$0xff]   ;;  %v3679_v25 = vld [vmem:[#allocation5 + $0x20] ss:$16 sps:$4 sm:$0xff]  }
  0xb5   :  { %1362 = vmatprep.subr.bf16.mxu0 %v3597_v26  ;;  %1526 = vmatprep.subr.bf16.mxu1 %v3600_v27  ;;  %v3682_v26 = vld [vmem:[#allocation5 + $0x28] ss:$16 sps:$4 sm:$0xff]   ;;  %v3687_v27 = vld [vmem:[#allocation5 + $0x44] ss:$16 sps:$4 sm:$0xff]  }
  0xb8   :  { %1363 = vmatpush1.bf16.msra.mxu0 %v3595_v28  ;;  %1527 = vmatpush1.bf16.msra.mxu1 %v3598_v29  ;;  %v3690_v28 = vld [vmem:[#allocation5 + $0x4c] ss:$16 sps:$4 sm:$0xff]   ;;  %v3685_v29 = vld [vmem:[#allocation5 + $0x40] ss:$16 sps:$4 sm:$0xff]  }
  0xb9   :  { %1364 = vmatprep.subr.bf16.mxu0 %v3603_v30  ;;  %1528 = vmatprep.subr.bf16.mxu1 %v3606_v31  ;;  %v3688_v30 = vld [vmem:[#allocation5 + $0x48] ss:$16 sps:$4 sm:$0xff]   ;;  %v3693_v31 = vld [vmem:[#allocation5 + $0x64] ss:$16 sps:$4 sm:$0xff]  }
  0xbc   :  { %1365 = vmatpush1.bf16.msra.mxu0 %v3601_v32  ;;  %1529 = vmatpush1.bf16.msra.mxu1 %v3604_v33  ;;  %v3696_v32 = vld [vmem:[#allocation5 + $0x6c] ss:$16 sps:$4 sm:$0xff]   ;;  %v3691_v33 = vld [vmem:[#allocation5 + $0x60] ss:$16 sps:$4 sm:$0xff]  }
  0xbd   :  { %1366 = vmatprep.subr.bf16.mxu0 %v3609_v34  ;;  %1530 = vmatprep.subr.bf16.mxu1 %v3612_v35  ;;  %v3694_v34 = vld [vmem:[#allocation5 + $0x68] ss:$16 sps:$4 sm:$0xff]   ;;  %v3699_v35 = vld [vmem:[#allocation5 + $0x84] ss:$16 sps:$4 sm:$0xff]  }
  0xc0   :  { %1367 = vmatpush1.bf16.msra.mxu0 %v3607_v36  ;;  %1531 = vmatpush1.bf16.msra.mxu1 %v3610_v37  ;;  %v3702_v36 = vld [vmem:[#allocation5 + $0x8c] ss:$16 sps:$4 sm:$0xff]   ;;  %v3697_v37 = vld [vmem:[#allocation5 + $0x80] ss:$16 sps:$4 sm:$0xff]  }
  0xc1   :  { %1368 = vmatprep.subr.bf16.mxu0 %v3615_v38  ;;  %1532 = vmatprep.subr.bf16.mxu1 %v3618_v39  ;;  %v3700_v38 = vld [vmem:[#allocation5 + $0x88] ss:$16 sps:$4 sm:$0xff]   ;;  %v3705_v39 = vld [vmem:[#allocation5 + $0xa4] ss:$16 sps:$4 sm:$0xff]  }
  0xc4   :  { %1369 = vmatpush1.bf16.msra.mxu0 %v3613_v40  ;;  %1533 = vmatpush1.bf16.msra.mxu1 %v3616_v41  ;;  %v3708_v40 = vld [vmem:[#allocation5 + $0xac] ss:$16 sps:$4 sm:$0xff]   ;;  %v3703_v41 = vld [vmem:[#allocation5 + $0xa0] ss:$16 sps:$4 sm:$0xff]  }
  0xc5   :  { %1370 = vmatprep.subr.bf16.mxu0 %v3621_v42  ;;  %1534 = vmatprep.subr.bf16.mxu1 %v3624_v43  ;;  %v3706_v42 = vld [vmem:[#allocation5 + $0xa8] ss:$16 sps:$4 sm:$0xff]   ;;  %v3711_v43 = vld [vmem:[#allocation5 + $0xc4] ss:$16 sps:$4 sm:$0xff]  }
  0xc8   :  { %1371 = vmatpush1.bf16.msra.mxu0 %v3619_v44  ;;  %1535 = vmatpush1.bf16.msra.mxu1 %v3622_v45  ;;  %v3714_v44 = vld [vmem:[#allocation5 + $0xcc] ss:$16 sps:$4 sm:$0xff]   ;;  %v3709_v45 = vld [vmem:[#allocation5 + $0xc0] ss:$16 sps:$4 sm:$0xff]  }
  0xc9   :  { %1372 = vmatprep.subr.bf16.mxu0 %v3627_v46  ;;  %1536 = vmatprep.subr.bf16.mxu1 %v3630_v47  ;;  %v3712_v46 = vld [vmem:[#allocation5 + $0xc8] ss:$16 sps:$4 sm:$0xff]   ;;  %v3717_v47 = vld [vmem:[#allocation5 + $0xe4] ss:$16 sps:$4 sm:$0xff]  }
  0xcc   :  { %1373 = vmatpush1.bf16.msra.mxu0 %v3625_v48  ;;  %1537 = vmatpush1.bf16.msra.mxu1 %v3628_v49  ;;  %v3720_v48 = vld [vmem:[#allocation5 + $0xec] ss:$16 sps:$4 sm:$0xff]   ;;  %v3715_v49 = vld [vmem:[#allocation5 + $0xe0] ss:$16 sps:$4 sm:$0xff]  }
  0xcd   :  { %1374 = vmatprep.subr.bf16.mxu0 %v3633_v50  ;;  %1538 = vmatprep.subr.bf16.mxu1 %v3636_v51  ;;  %v3718_v50 = vld [vmem:[#allocation5 + $0xe8] ss:$16 sps:$4 sm:$0xff]   ;;  %v3723_v51 = vld [vmem:[#allocation5 + $0x104] ss:$16 sps:$4 sm:$0xff]  }
  0xd0   :  { %1375 = vmatpush1.bf16.msra.mxu0 %v3631_v52  ;;  %1539 = vmatpush1.bf16.msra.mxu1 %v3634_v53  ;;  %v3726_v52 = vld [vmem:[#allocation5 + $0x10c] ss:$16 sps:$4 sm:$0xff]   ;;  %v3721_v53 = vld [vmem:[#allocation5 + $0x100] ss:$16 sps:$4 sm:$0xff]  }
  0xd1   :  { %1376 = vmatprep.subr.bf16.mxu0 %v3639_v54  ;;  %1540 = vmatprep.subr.bf16.mxu1 %v3642_v55  ;;  %v3724_v54 = vld [vmem:[#allocation5 + $0x108] ss:$16 sps:$4 sm:$0xff]   ;;  %v3729_v55 = vld [vmem:[#allocation5 + $0x124] ss:$16 sps:$4 sm:$0xff]  }
  0xd4   :  { %1377 = vmatpush1.bf16.msra.mxu0 %v3637_v56  ;;  %1541 = vmatpush1.bf16.msra.mxu1 %v3640_v57  ;;  %v3732_v56 = vld [vmem:[#allocation5 + $0x12c] ss:$16 sps:$4 sm:$0xff]   ;;  %v3727_v57 = vld [vmem:[#allocation5 + $0x120] ss:$16 sps:$4 sm:$0xff]  }
  0xd5   :  { %1378 = vmatprep.subr.bf16.mxu0 %v3645_v58  ;;  %1542 = vmatprep.subr.bf16.mxu1 %v3648_v59  ;;  %v3730_v58 = vld [vmem:[#allocation5 + $0x128] ss:$16 sps:$4 sm:$0xff]   ;;  %v3735_v59 = vld [vmem:[#allocation5 + $0x144] ss:$16 sps:$4 sm:$0xff]  }
  0xd8   :  { %1379 = vmatpush1.bf16.msra.mxu0 %v3643_v60  ;;  %1543 = vmatpush1.bf16.msra.mxu1 %v3646_v61  ;;  %v3738_v60 = vld [vmem:[#allocation5 + $0x14c] ss:$16 sps:$4 sm:$0xff]   ;;  %v3733_v61 = vld [vmem:[#allocation5 + $0x140] ss:$16 sps:$4 sm:$0xff]  }
  0xd9   :  { %1380 = vmatprep.subr.bf16.mxu0 %v3651_v62  ;;  %1544 = vmatprep.subr.bf16.mxu1 %v3654_v63  ;;  %v3736_v62 = vld [vmem:[#allocation5 + $0x148] ss:$16 sps:$4 sm:$0xff]   ;;  %v3741_v63 = vld [vmem:[#allocation5 + $0x164] ss:$16 sps:$4 sm:$0xff]  }
  0xdc   :  { %1381 = vmatpush1.bf16.msra.mxu0 %v3649_v0  ;;  %1545 = vmatpush1.bf16.msra.mxu1 %v3652_v1  ;;  %v3744_v0 = vld [vmem:[#allocation5 + $0x16c] ss:$16 sps:$4 sm:$0xff]   ;;  %v3739_v1 = vld [vmem:[#allocation5 + $0x160] ss:$16 sps:$4 sm:$0xff]  }
  0xdd   :  { %1382 = vmatprep.subr.bf16.mxu0 %v3657_v2  ;;  %1546 = vmatprep.subr.bf16.mxu1 %v3660_v3  ;;  %v3742_v2 = vld [vmem:[#allocation5 + $0x168] ss:$16 sps:$4 sm:$0xff]   ;;  %v3747_v3 = vld [vmem:[#allocation5 + $0x184] ss:$16 sps:$4 sm:$0xff]  }
  0xe0   :  { %1383 = vmatpush1.bf16.msra.mxu0 %v3655_v4  ;;  %1547 = vmatpush1.bf16.msra.mxu1 %v3658_v5  ;;  %v3750_v4 = vld [vmem:[#allocation5 + $0x18c] ss:$16 sps:$4 sm:$0xff]   ;;  %v3745_v5 = vld [vmem:[#allocation5 + $0x180] ss:$16 sps:$4 sm:$0xff]  }
  0xe1   :  { %1384 = vmatprep.subr.bf16.mxu0 %v3663_v6  ;;  %1548 = vmatprep.subr.bf16.mxu1 %v3666_v7  ;;  %v3748_v6 = vld [vmem:[#allocation5 + $0x188] ss:$16 sps:$4 sm:$0xff]   ;;  %v3753_v7 = vld [vmem:[#allocation5 + $0x1a4] ss:$16 sps:$4 sm:$0xff]  }
  0xe4   :  { %1385 = vmatpush1.bf16.msra.mxu0 %v3661_v8  ;;  %1549 = vmatpush1.bf16.msra.mxu1 %v3664_v9  ;;  %v3756_v8 = vld [vmem:[#allocation5 + $0x1ac] ss:$16 sps:$4 sm:$0xff]   ;;  %v3751_v9 = vld [vmem:[#allocation5 + $0x1a0] ss:$16 sps:$4 sm:$0xff]  }
  0xe5   :  { %1395 = vmatprep.subr.bf16.mxu0 %v3669_v11  ;;  %1559 = vmatprep.subr.bf16.mxu1 %v3672_v12  ;;  %v3759_v11 = vld [vmem:[#allocation5 + $0x1c4] ss:$16 sps:$4 sm:$0xff]   ;;  %v3762_v12 = vld [vmem:[#allocation5 + $0x1cc] ss:$16 sps:$4 sm:$0xff]  }
  0xe7   :  { %1387 = vmatmul.mubr.bf16.vlgmr.msra.gmra.mrb[0].mxu0 %v67_v15  ;;  %1551 = vmatmul.mubr.bf16.vlgmr.msra.gmra.mrb[0].mxu1 %v67_v15  ;;  %v3765_v15 = vld [vmem:[#allocation5 + $0x1e4] ss:$16 sps:$4 sm:$0xff]  }
  0xe8   :  { %1396 = vmatpush1.bf16.msra.mxu0 %v3667_v13  ;;  %1560 = vmatpush1.bf16.msra.mxu1 %v3670_v14  ;;  %v3757_v13 = vld [vmem:[#allocation5 + $0x1c0] ss:$16 sps:$4 sm:$0xff]   ;;  %v3760_v14 = vld [vmem:[#allocation5 + $0x1c8] ss:$16 sps:$4 sm:$0xff]  }
  0xe9   :  { %1427 = vmatprep.mubr.bf16.mxu0 %v3973_v18  ;;  %1591 = vmatprep.mubr.bf16.mxu1 %v3973_v18  ;;  %v3766_v18 = vld [vmem:[#allocation5 + $0x1e8] ss:$16 sps:$4 sm:$0xff]  }
  0xea   :  { %2398 = vmatprep.subr.bf16.mxu0 %v3675_v16  ;;  %2480 = vmatprep.subr.bf16.mxu1 %v3678_v17  ;;  %v3768_v16 = vld [vmem:[#allocation5 + $0x1ec] ss:$16 sps:$4 sm:$0xff]   ;;  %v3763_v17 = vld [vmem:[#allocation5 + $0x1e0] ss:$16 sps:$4 sm:$0xff]  }
  0xf3   :  { %3126 = vmatmul.mubr.msk.bf16.vlgmr.msra.gmra.mrb[0].mxu0 %vm1268_vm0, %v69_v22  ;;  %3127 = vmatmul.mubr.msk.bf16.vlgmr.msra.gmra.mrb[0].mxu1 %vm1268_vm0, %v69_v22 }
  0xf4   :  { %2399 = vmatpush1.bf16.msra.mxu0 %v3673_v20  ;;  %2481 = vmatpush1.bf16.msra.mxu1 %v3676_v21  ;;  %v3774_v20 = vld [vmem:[#allocation5 + $0x20c] ss:$16 sps:$4 sm:$0xff]   ;;  %v268_v21 = vlaneseq }
  0xf5   :  { %2400 = vmatprep.subr.bf16.mxu0 %v3681_v23  ;;  %2482 = vmatprep.subr.bf16.mxu1 %v3684_v24  ;;  %v4066_v24 = vld [vmem:[%s4210_s2] sm:$0xf] }
  0xf6   :  { %v4060_v22 = vshrl.u32 %v268_v21, 7  ;;  %v3831_v21 = vld [vmem:[#allocation5 + $0x344] ss:$16 sps:$4 sm:$0xff]  }
  0xf8   :  { %2401 = vmatpush1.bf16.msra.mxu0 %v3679_v25  ;;  %2483 = vmatpush1.bf16.msra.mxu1 %v3682_v26  ;;  %v270_v23 = vsub.s32 0, %v4060_v22  ;;  %v274_v25 = vsub.s32 1, %v4060_v22  ;;  %v282_v26 = vsub.s32 3, %v4060_v22 }
  0xf9   :  { %2402 = vmatprep.subr.bf16.mxu0 %v3687_v27  ;;  %2484 = vmatprep.subr.bf16.mxu1 %v3690_v28 }
  0xfa   :  { %v271_v27 = vrot.slane %v4066_v24, %v270_v23  ;;  %v275_v28 = vrot.slane %v4066_v24, %v274_v25 }
  0xfc   :  { %2403 = vmatpush1.bf16.msra.mxu0 %v3685_v29  ;;  %2485 = vmatpush1.bf16.msra.mxu1 %v3688_v30  ;;  %v283_v29 = vrot.slane %v4066_v24, %v282_v26 }
  0xfd   :  { %2404 = vmatprep.subr.bf16.mxu0 %v3693_v31  ;;  %2486 = vmatprep.subr.bf16.mxu1 %v3696_v32 }
 0x100   :  { %2405 = vmatpush1.bf16.msra.mxu0 %v3691_v33  ;;  %2487 = vmatpush1.bf16.msra.mxu1 %v3694_v34 }
 0x101   :  { %2406 = vmatprep.subr.bf16.mxu0 %v3699_v35  ;;  %2488 = vmatprep.subr.bf16.mxu1 %v3702_v36 }
 0x104   :  { %2407 = vmatpush1.bf16.msra.mxu0 %v3697_v37  ;;  %2489 = vmatpush1.bf16.msra.mxu1 %v3700_v38 }
 0x105   :  { %2408 = vmatprep.subr.bf16.mxu0 %v3705_v39  ;;  %2490 = vmatprep.subr.bf16.mxu1 %v3708_v40 }
 0x108   :  { %2409 = vmatpush1.bf16.msra.mxu0 %v3703_v41  ;;  %2491 = vmatpush1.bf16.msra.mxu1 %v3706_v42 }
 0x109   :  { %2410 = vmatprep.subr.bf16.mxu0 %v3711_v43  ;;  %2492 = vmatprep.subr.bf16.mxu1 %v3714_v44 }
 0x10c   :  { %2411 = vmatpush1.bf16.msra.mxu0 %v3709_v45  ;;  %2493 = vmatpush1.bf16.msra.mxu1 %v3712_v46  ;;  %v3769_v45 = vld [vmem:[#allocation5 + $0x200] ss:$16 sps:$4 sm:$0xff]   ;;  %v3772_v46 = vld [vmem:[#allocation5 + $0x208] ss:$16 sps:$4 sm:$0xff]  }
 0x10d   :  { %2412 = vmatprep.subr.bf16.mxu0 %v3717_v47  ;;  %2494 = vmatprep.subr.bf16.mxu1 %v3720_v48  ;;  %v3777_v48 = vld [vmem:[#allocation5 + $0x224] ss:$16 sps:$4 sm:$0xff]  }
 0x110   :  { %2413 = vmatpush1.bf16.msra.mxu0 %v3715_v49  ;;  %2495 = vmatpush1.bf16.msra.mxu1 %v3718_v50  ;;  %v3780_v49 = vld [vmem:[#allocation5 + $0x22c] ss:$16 sps:$4 sm:$0xff]  }
 0x111   :  { %2414 = vmatprep.subr.bf16.mxu0 %v3723_v51  ;;  %2496 = vmatprep.subr.bf16.mxu1 %v3726_v52  ;;  %v3775_v51 = vld [vmem:[#allocation5 + $0x220] ss:$16 sps:$4 sm:$0xff]   ;;  %v3778_v52 = vld [vmem:[#allocation5 + $0x228] ss:$16 sps:$4 sm:$0xff]  }
 0x114   :  { %2415 = vmatpush1.bf16.msra.mxu0 %v3721_v53  ;;  %2497 = vmatpush1.bf16.msra.mxu1 %v3724_v54  ;;  %v3783_v53 = vld [vmem:[#allocation5 + $0x244] ss:$16 sps:$4 sm:$0xff]   ;;  %v3786_v54 = vld [vmem:[#allocation5 + $0x24c] ss:$16 sps:$4 sm:$0xff]  }
 0x115   :  { %2416 = vmatprep.subr.bf16.mxu0 %v3729_v55  ;;  %2498 = vmatprep.subr.bf16.mxu1 %v3732_v56  ;;  %v3781_v55 = vld [vmem:[#allocation5 + $0x240] ss:$16 sps:$4 sm:$0xff]   ;;  %v3784_v56 = vld [vmem:[#allocation5 + $0x248] ss:$16 sps:$4 sm:$0xff]  }
 0x118   :  { %2417 = vmatpush1.bf16.msra.mxu0 %v3727_v57  ;;  %2499 = vmatpush1.bf16.msra.mxu1 %v3730_v58  ;;  %v3789_v57 = vld [vmem:[#allocation5 + $0x264] ss:$16 sps:$4 sm:$0xff]   ;;  %v3792_v58 = vld [vmem:[#allocation5 + $0x26c] ss:$16 sps:$4 sm:$0xff]  }
 0x119   :  { %2418 = vmatprep.subr.bf16.mxu0 %v3735_v59  ;;  %2500 = vmatprep.subr.bf16.mxu1 %v3738_v60  ;;  %v3787_v59 = vld [vmem:[#allocation5 + $0x260] ss:$16 sps:$4 sm:$0xff]   ;;  %v3790_v60 = vld [vmem:[#allocation5 + $0x268] ss:$16 sps:$4 sm:$0xff]  }
 0x11c   :  { %2419 = vmatpush1.bf16.msra.mxu0 %v3733_v61  ;;  %2501 = vmatpush1.bf16.msra.mxu1 %v3736_v62  ;;  %v3795_v61 = vld [vmem:[#allocation5 + $0x284] ss:$16 sps:$4 sm:$0xff]   ;;  %v3798_v62 = vld [vmem:[#allocation5 + $0x28c] ss:$16 sps:$4 sm:$0xff]  }
 0x11d   :  { %2420 = vmatprep.subr.bf16.mxu0 %v3741_v63  ;;  %2502 = vmatprep.subr.bf16.mxu1 %v3744_v0  ;;  %v3793_v63 = vld [vmem:[#allocation5 + $0x280] ss:$16 sps:$4 sm:$0xff]   ;;  %v3796_v0 = vld [vmem:[#allocation5 + $0x288] ss:$16 sps:$4 sm:$0xff]  }
 0x120   :  { %2421 = vmatpush1.bf16.msra.mxu0 %v3739_v1  ;;  %2503 = vmatpush1.bf16.msra.mxu1 %v3742_v2  ;;  %v3801_v1 = vld [vmem:[#allocation5 + $0x2a4] ss:$16 sps:$4 sm:$0xff]   ;;  %v3804_v2 = vld [vmem:[#allocation5 + $0x2ac] ss:$16 sps:$4 sm:$0xff]  }
 0x121   :  { %2422 = vmatprep.subr.bf16.mxu0 %v3747_v3  ;;  %2504 = vmatprep.subr.bf16.mxu1 %v3750_v4  ;;  %v3799_v3 = vld [vmem:[#allocation5 + $0x2a0] ss:$16 sps:$4 sm:$0xff]   ;;  %v3802_v4 = vld [vmem:[#allocation5 + $0x2a8] ss:$16 sps:$4 sm:$0xff]  }
 0x124   :  { %2423 = vmatpush1.bf16.msra.mxu0 %v3745_v5  ;;  %2505 = vmatpush1.bf16.msra.mxu1 %v3748_v6  ;;  %v3807_v5 = vld [vmem:[#allocation5 + $0x2c4] ss:$16 sps:$4 sm:$0xff]   ;;  %v3810_v6 = vld [vmem:[#allocation5 + $0x2cc] ss:$16 sps:$4 sm:$0xff]  }
 0x125   :  { %2424 = vmatprep.subr.bf16.mxu0 %v3753_v7  ;;  %2506 = vmatprep.subr.bf16.mxu1 %v3756_v8  ;;  %v3805_v7 = vld [vmem:[#allocation5 + $0x2c0] ss:$16 sps:$4 sm:$0xff]   ;;  %v3808_v8 = vld [vmem:[#allocation5 + $0x2c8] ss:$16 sps:$4 sm:$0xff]  }
 0x128   :  { %2425 = vmatpush1.bf16.msra.mxu0 %v3751_v9  ;;  %2507 = vmatpush1.bf16.msra.mxu1 %v3754_v10  ;;  %v3813_v9 = vld [vmem:[#allocation5 + $0x2e4] ss:$16 sps:$4 sm:$0xff]   ;;  %v3816_v10 = vld [vmem:[#allocation5 + $0x2ec] ss:$16 sps:$4 sm:$0xff]  }
 0x129   :  { %2426 = vmatprep.subr.bf16.mxu0 %v3759_v11  ;;  %2508 = vmatprep.subr.bf16.mxu1 %v3762_v12  ;;  %v3811_v11 = vld [vmem:[#allocation5 + $0x2e0] ss:$16 sps:$4 sm:$0xff]   ;;  %v3814_v12 = vld [vmem:[#allocation5 + $0x2e8] ss:$16 sps:$4 sm:$0xff]  }
 0x12c   :  { %2427 = vmatpush1.bf16.msra.mxu0 %v3757_v13  ;;  %2509 = vmatpush1.bf16.msra.mxu1 %v3760_v14  ;;  %v3819_v13 = vld [vmem:[#allocation5 + $0x304] ss:$16 sps:$4 sm:$0xff]   ;;  %v3822_v14 = vld [vmem:[#allocation5 + $0x30c] ss:$16 sps:$4 sm:$0xff]  }
 0x12d   :  { %2428 = vmatprep.subr.bf16.mxu0 %v3765_v15  ;;  %2510 = vmatprep.subr.bf16.mxu1 %v3768_v16  ;;  %v3817_v15 = vld [vmem:[#allocation5 + $0x300] ss:$16 sps:$4 sm:$0xff]   ;;  %v3820_v16 = vld [vmem:[#allocation5 + $0x308] ss:$16 sps:$4 sm:$0xff]  }
 0x130   :  { %2429 = vmatpush1.bf16.msra.mxu0 %v3763_v17  ;;  %2511 = vmatpush1.bf16.msra.mxu1 %v3766_v18  ;;  %v3825_v17 = vld [vmem:[#allocation5 + $0x324] ss:$16 sps:$4 sm:$0xff]   ;;  %v3828_v18 = vld [vmem:[#allocation5 + $0x32c] ss:$16 sps:$4 sm:$0xff]  }
 0x131   :  { %2439 = vmatprep.subr.bf16.mxu0 %v3771_v19  ;;  %2521 = vmatprep.subr.bf16.mxu1 %v3774_v20  ;;  %v3823_v19 = vld [vmem:[#allocation5 + $0x320] ss:$16 sps:$4 sm:$0xff]   ;;  %v3826_v20 = vld [vmem:[#allocation5 + $0x328] ss:$16 sps:$4 sm:$0xff]  }
 0x1c6   :  { %v1429_v30 = vpop.f32.mrb[0].mxu0  ;;  %v4079_v31 = vpop.f32.mrb[0].mxu1 }
 0x1c7   :  { %v3333_v32 = vadd.f32 %v1429_v30, %v271_v27  ;;  %v1431_v33 = vpop.f32.mrb[1].mxu0  ;;  %v1595_v34 = vpop.f32.mrb[1].mxu1  ;;  %v3834_v27 = vld [vmem:[#allocation5 + $0x34c] ss:$16 sps:$4 sm:$0xff]   ;;  %v3837_v30 = vld [vmem:[#allocation5 + $0x364] ss:$16 sps:$4 sm:$0xff]  }
 0x1c8   :  { %v3334_v35 = vadd.f32 %v1431_v33, %v275_v28  ;;  %v3336_v36 = vadd.f32 %v1595_v34, %v283_v29  ;;  %v1433_v37 = vpop.f32.mrb[2].mxu0  ;;  %v1597_v38 = vpop.f32.mrb[2].mxu1  ;;  %v3829_v28 = vld [vmem:[#allocation5 + $0x340] ss:$16 sps:$4 sm:$0xff]   ;;  %v3832_v29 = vld [vmem:[#allocation5 + $0x348] ss:$16 sps:$4 sm:$0xff]  }
 0x1c9   :  { %v1600_v39 = vmax.f32 %v3333_v32, 0.0  ;;  %v1434_v40 = vpop.f32.mrb[3].mxu0  ;;  %v1598_v41 = vpop.f32.mrb[3].mxu1  ;;  %v3840_v32 = vld [vmem:[#allocation5 + $0x36c] ss:$16 sps:$4 sm:$0xff]  }
 0x1ca   :  { %v1601_v42 = vmax.f32 %v3334_v35, 0.0  ;;  %v1603_v43 = vmax.f32 %v3336_v36, 0.0  ;;  %v3835_v33 = vld [vmem:[#allocation5 + $0x360] ss:$16 sps:$4 sm:$0xff]   ;;  %v3838_v34 = vld [vmem:[#allocation5 + $0x368] ss:$16 sps:$4 sm:$0xff]  }
 0x1cb   :  { %v1604_v47 = vpack.c.bf16 %v1600_v39, %v1600_v39  ;;  %v3843_v35 = vld [vmem:[#allocation5 + $0x384] ss:$16 sps:$4 sm:$0xff]   ;;  %v3846_v36 = vld [vmem:[#allocation5 + $0x38c] ss:$16 sps:$4 sm:$0xff]   ;;  %v3841_v37 = vld [vmem:[#allocation5 + $0x380] ss:$16 sps:$4 sm:$0xff]  }
 0x1cc   :  { %v1605_v44 = vpack.c.bf16 %v1601_v42, %v1601_v42  ;;  %v1607_v50 = vpack.c.bf16 %v1603_v43, %v1603_v43  ;;  %v3844_v38 = vld [vmem:[#allocation5 + $0x388] ss:$16 sps:$4 sm:$0xff]   ;;  %v278_v39 = vsub.s32 2, %v4060_v22  ;;  %v3849_v40 = vld [vmem:[#allocation5 + $0x3a4] ss:$16 sps:$4 sm:$0xff]  }
 0x1cd   :  { %v3852_v41 = vld [vmem:[#allocation5 + $0x3ac] ss:$16 sps:$4 sm:$0xff]   ;;  %v3847_v42 = vld [vmem:[#allocation5 + $0x3a0] ss:$16 sps:$4 sm:$0xff]   ;;  %v3850_v43 = vld [vmem:[#allocation5 + $0x3a8] ss:$16 sps:$4 sm:$0xff]  }
 0x1ce   :  { %2430 = vmatprep.mubr.bf16.mxu0 %v1605_v44  ;;  %2512 = vmatprep.mubr.bf16.mxu1 %v1605_v44  ;;  %v279_v44 = vrot.slane %v4066_v24, %v278_v39  ;;  %v3865_v24 = vld [vmem:[%s4213_s5 + $0x40] sm:$0xff]  }
 0x1cf   :  { %2431 = vmatmul.mubr.bf16.vlgmr.msra.gmra.mrb[4].mxu0 %v1604_v47  ;;  %2513 = vmatmul.mubr.bf16.vlgmr.msra.gmra.mrb[4].mxu1 %v1604_v47  ;;  %v3853_v47 = vld [vmem:[#allocation5 + $0x3c0] ss:$16 sps:$4 sm:$0xff]  }
 0x1d0   :  { %2440 = vmatpush1.bf16.msra.mxu0 %v3769_v45  ;;  %2522 = vmatpush1.bf16.msra.mxu1 %v3772_v46  ;;  %v3855_v45 = vld [vmem:[#allocation5 + $0x3c4] ss:$16 sps:$4 sm:$0xff]   ;;  %v3858_v46 = vld [vmem:[#allocation5 + $0x3cc] ss:$16 sps:$4 sm:$0xff]  }
 0x1d1   :  { %2471 = vmatprep.mubr.bf16.mxu0 %v1607_v50  ;;  %2553 = vmatprep.mubr.bf16.mxu1 %v1607_v50  ;;  %v3861_v50 = vld [vmem:[#allocation5 + $0x3e4] ss:$16 sps:$4 sm:$0xff]  }
 0x1d2   :  { %2441 = vmatprep.subr.bf16.mxu0 %v3777_v48  ;;  %2523 = vmatprep.subr.bf16.mxu1 %v3780_v49  ;;  %v3856_v48 = vld [vmem:[#allocation5 + $0x3c8] ss:$16 sps:$4 sm:$0xff]   ;;  %v3335_v49 = vadd.f32 %v4079_v31, %v279_v44  ;;  %v3867_v31 = vld [vmem:[%s4213_s5] sm:$0xff]  }
 0x1d4   :  { %2442 = vmatpush1.bf16.msra.mxu0 %v3775_v51  ;;  %2524 = vmatpush1.bf16.msra.mxu1 %v3778_v52  ;;  %v3864_v51 = vld [vmem:[#allocation5 + $0x3ec] ss:$16 sps:$4 sm:$0xff]   ;;  %v3859_v52 = vld [vmem:[#allocation5 + $0x3e0] ss:$16 sps:$4 sm:$0xff]  }
 0x1d5   :  { %2443 = vmatprep.subr.bf16.mxu0 %v3783_v53  ;;  %2525 = vmatprep.subr.bf16.mxu1 %v3786_v54  ;;  %v3862_v53 = vld [vmem:[#allocation5 + $0x3e8] ss:$16 sps:$4 sm:$0xff]   ;;  %v1602_v54 = vmax.f32 %v3335_v49, 0.0 }
 0x1d8   :  { %2444 = vmatpush1.bf16.msra.mxu0 %v3781_v55  ;;  %2526 = vmatpush1.bf16.msra.mxu1 %v3784_v56  ;;  %v3866_v55 = vld [vmem:[%s4213_s5 + $0xc0] sm:$0xff]  }
 0x1d9   :  { %2445 = vmatprep.subr.bf16.mxu0 %v3789_v57  ;;  %2527 = vmatprep.subr.bf16.mxu1 %v3792_v58  ;;  %v3868_v56 = vld [vmem:[%s4213_s5 + $0x80] sm:$0xff]   ;;  %v1606_v57 = vpack.c.bf16 %v1602_v54, %v1602_v54  ;;  %v3869_v58 = vld [vmem:[%s4213_s5 + $0x48] sm:$0xff]  }
 0x1dc   :  { %2446 = vmatpush1.bf16.msra.mxu0 %v3787_v59  ;;  %2528 = vmatpush1.bf16.msra.mxu1 %v3790_v60  ;;  %v3870_v59 = vld [vmem:[%s4213_s5 + $0xc8] sm:$0xff]  }
 0x1dd   :  { %2447 = vmatprep.subr.bf16.mxu0 %v3795_v61  ;;  %2529 = vmatprep.subr.bf16.mxu1 %v3798_v62  ;;  %v3871_v60 = vld [vmem:[%s4213_s5 + $0x8] sm:$0xff]   ;;  %v3873_v62 = vld [vmem:[%s4213_s5 + $0x50] sm:$0xff]  }
 0x1de   :  { %v3872_v61 = vld [vmem:[%s4213_s5 + $0x88] sm:$0xff]  }
 0x1e0   :  { %2448 = vmatpush1.bf16.msra.mxu0 %v3793_v63  ;;  %2530 = vmatpush1.bf16.msra.mxu1 %v3796_v0  ;;  %v3874_v63 = vld [vmem:[%s4213_s5 + $0xd0] sm:$0xff]  }
 0x1e1   :  { %2449 = vmatprep.subr.bf16.mxu0 %v3801_v1  ;;  %2531 = vmatprep.subr.bf16.mxu1 %v3804_v2  ;;  %v3875_v0 = vld [vmem:[%s4213_s5 + $0x10] sm:$0xff]   ;;  %v3877_v2 = vld [vmem:[%s4213_s5 + $0x58] sm:$0xff]  }
 0x1e2   :  { %v3876_v1 = vld [vmem:[%s4213_s5 + $0x90] sm:$0xff]  }
 0x1e4   :  { %2450 = vmatpush1.bf16.msra.mxu0 %v3799_v3  ;;  %2532 = vmatpush1.bf16.msra.mxu1 %v3802_v4  ;;  %v3878_v3 = vld [vmem:[%s4213_s5 + $0xd8] sm:$0xff]  }
 0x1e5   :  { %2451 = vmatprep.subr.bf16.mxu0 %v3807_v5  ;;  %2533 = vmatprep.subr.bf16.mxu1 %v3810_v6  ;;  %v3879_v4 = vld [vmem:[%s4213_s5 + $0x18] sm:$0xff]   ;;  %v3881_v6 = vld [vmem:[%s4213_s5 + $0x60] sm:$0xff]  }
 0x1e6   :  { %v3880_v5 = vld [vmem:[%s4213_s5 + $0x98] sm:$0xff]  }
 0x1e8   :  { %2452 = vmatpush1.bf16.msra.mxu0 %v3805_v7  ;;  %2534 = vmatpush1.bf16.msra.mxu1 %v3808_v8  ;;  %v3882_v7 = vld [vmem:[%s4213_s5 + $0xe0] sm:$0xff]  }
 0x1e9   :  { %2453 = vmatprep.subr.bf16.mxu0 %v3813_v9  ;;  %2535 = vmatprep.subr.bf16.mxu1 %v3816_v10  ;;  %v3883_v8 = vld [vmem:[%s4213_s5 + $0x20] sm:$0xff]   ;;  %v3885_v10 = vld [vmem:[%s4213_s5 + $0x68] sm:$0xff]  }
 0x1ea   :  { %v3884_v9 = vld [vmem:[%s4213_s5 + $0xa0] sm:$0xff]  }
 0x1ec   :  { %2454 = vmatpush1.bf16.msra.mxu0 %v3811_v11  ;;  %2536 = vmatpush1.bf16.msra.mxu1 %v3814_v12  ;;  %v3886_v11 = vld [vmem:[%s4213_s5 + $0xe8] sm:$0xff]  }
 0x1ed   :  { %2455 = vmatprep.subr.bf16.mxu0 %v3819_v13  ;;  %2537 = vmatprep.subr.bf16.mxu1 %v3822_v14  ;;  %v3887_v12 = vld [vmem:[%s4213_s5 + $0x28] sm:$0xff]   ;;  %v3889_v14 = vld [vmem:[%s4213_s5 + $0x70] sm:$0xff]  }
 0x1ee   :  { %v3888_v13 = vld [vmem:[%s4213_s5 + $0xa8] sm:$0xff]  }
 0x1f0   :  { %2456 = vmatpush1.bf16.msra.mxu0 %v3817_v15  ;;  %2538 = vmatpush1.bf16.msra.mxu1 %v3820_v16  ;;  %v3890_v15 = vld [vmem:[%s4213_s5 + $0xf0] sm:$0xff]  }
 0x1f1   :  { %2457 = vmatprep.subr.bf16.mxu0 %v3825_v17  ;;  %2539 = vmatprep.subr.bf16.mxu1 %v3828_v18  ;;  %v3891_v16 = vld [vmem:[%s4213_s5 + $0x30] sm:$0xff]   ;;  %v3893_v18 = vld [vmem:[%s4213_s5 + $0x78] sm:$0xff]  }
 0x1f2   :  { %v3892_v17 = vld [vmem:[%s4213_s5 + $0xb0] sm:$0xff]  }
 0x1f4   :  { %2458 = vmatpush1.bf16.msra.mxu0 %v3823_v19  ;;  %2540 = vmatpush1.bf16.msra.mxu1 %v3826_v20  ;;  %v3894_v19 = vld [vmem:[%s4213_s5 + $0xf8] sm:$0xff]  }
 0x1f5   :  { %2459 = vmatprep.subr.bf16.mxu0 %v3831_v21  ;;  %2541 = vmatprep.subr.bf16.mxu1 %v3834_v27  ;;  %v3895_v20 = vld [vmem:[%s4213_s5 + $0x38] sm:$0xff]   ;;  %v1736_v27 = vld [vmem:[%s4212_s4] sm:$0xf] }
 0x1f6   :  { %v3896_v21 = vld [vmem:[%s4213_s5 + $0xb8] sm:$0xff]  }
 0x1f8   :  { %2460 = vmatpush1.bf16.msra.mxu0 %v3829_v28  ;;  %2542 = vmatpush1.bf16.msra.mxu1 %v3832_v29  ;;  %v1741_v28 = vrot.slane %v1736_v27, %v270_v23  ;;  %v1749_v29 = vrot.slane %v1736_v27, %v278_v39 }
 0x1f9   :  { %2461 = vmatprep.subr.bf16.mxu0 %v3837_v30  ;;  %2543 = vmatprep.subr.bf16.mxu1 %v3840_v32  ;;  %v1745_v30 = vrot.slane %v1736_v27, %v274_v25  ;;  %v1753_v32 = vrot.slane %v1736_v27, %v282_v26 }
 0x1fc   :  { %2462 = vmatpush1.bf16.msra.mxu0 %v3835_v33  ;;  %2544 = vmatpush1.bf16.msra.mxu1 %v3838_v34 }
 0x1fd   :  { %2463 = vmatprep.subr.bf16.mxu0 %v3843_v35  ;;  %2545 = vmatprep.subr.bf16.mxu1 %v3846_v36 }
 0x200   :  { %2464 = vmatpush1.bf16.msra.mxu0 %v3841_v37  ;;  %2546 = vmatpush1.bf16.msra.mxu1 %v3844_v38 }
 0x201   :  { %2465 = vmatprep.subr.bf16.mxu0 %v3849_v40  ;;  %2547 = vmatprep.subr.bf16.mxu1 %v3852_v41 }
 0x204   :  { %2466 = vmatpush1.bf16.msra.mxu0 %v3847_v42  ;;  %2548 = vmatpush1.bf16.msra.mxu1 %v3850_v43 }
 0x205   :  { %2467 = vmatprep.subr.bf16.mxu0 %v3855_v45  ;;  %2549 = vmatprep.subr.bf16.mxu1 %v3858_v46 }
 0x208   :  { %2468 = vmatpush1.bf16.msra.mxu0 %v3853_v47  ;;  %2550 = vmatpush1.bf16.msra.mxu1 %v3856_v48 }
 0x209   :  { %2469 = vmatprep.subr.bf16.mxu0 %v3861_v50  ;;  %2551 = vmatprep.subr.bf16.mxu1 %v3864_v51  ;;  %v3256_v51 = vld [vmem:[%s4214_s6] ss:$0 sm:$0xff] }
 0x20c   :  { %2470 = vmatpush1.bf16.msra.mxu0 %v3859_v52  ;;  %2552 = vmatpush1.bf16.msra.mxu1 %v3862_v53 }
 0x20d   :  { %3289 = vmatprep.subr.bf16.mxu0 %v3865_v24  ;;  %3311 = vmatprep.subr.bf16.mxu1 %v3866_v55 }
 0x20f   :  { %2472 = vmatmul.mubr.bf16.vlgmr.msra.gmra.mrb[4].mxu0 %v1606_v57  ;;  %2554 = vmatmul.mubr.bf16.vlgmr.msra.gmra.mrb[4].mxu1 %v1606_v57 }
 0x210   :  { %3290 = vmatpush3.bf16.msra.mxu0 %v3867_v31  ;;  %3312 = vmatpush3.bf16.msra.mxu1 %v3868_v56 }
 0x211   :  { %3291 = vmatprep.subr.bf16.mxu0 %v3869_v58  ;;  %3313 = vmatprep.subr.bf16.mxu1 %v3870_v59 }
 0x214   :  { %3292 = vmatpush3.bf16.msra.mxu0 %v3871_v60  ;;  %3314 = vmatpush3.bf16.msra.mxu1 %v3872_v61 }
 0x215   :  { %3293 = vmatprep.subr.bf16.mxu0 %v3873_v62  ;;  %3315 = vmatprep.subr.bf16.mxu1 %v3874_v63 }
 0x218   :  { %3294 = vmatpush3.bf16.msra.mxu0 %v3875_v0  ;;  %3316 = vmatpush3.bf16.msra.mxu1 %v3876_v1 }
 0x219   :  { %3295 = vmatprep.subr.bf16.mxu0 %v3877_v2  ;;  %3317 = vmatprep.subr.bf16.mxu1 %v3878_v3 }
 0x21c   :  { %3296 = vmatpush3.bf16.msra.mxu0 %v3879_v4  ;;  %3318 = vmatpush3.bf16.msra.mxu1 %v3880_v5 }
 0x21d   :  { %3297 = vmatprep.subr.bf16.mxu0 %v3881_v6  ;;  %3319 = vmatprep.subr.bf16.mxu1 %v3882_v7 }
 0x220   :  { %3298 = vmatpush3.bf16.msra.mxu0 %v3883_v8  ;;  %3320 = vmatpush3.bf16.msra.mxu1 %v3884_v9 }
 0x221   :  { %3299 = vmatprep.subr.bf16.mxu0 %v3885_v10  ;;  %3321 = vmatprep.subr.bf16.mxu1 %v3886_v11 }
 0x224   :  { %3300 = vmatpush3.bf16.msra.mxu0 %v3887_v12  ;;  %3322 = vmatpush3.bf16.msra.mxu1 %v3888_v13 }
 0x225   :  { %3301 = vmatprep.subr.bf16.mxu0 %v3889_v14  ;;  %3323 = vmatprep.subr.bf16.mxu1 %v3890_v15 }
 0x228   :  { %3302 = vmatpush3.bf16.msra.mxu0 %v3891_v16  ;;  %3324 = vmatpush3.bf16.msra.mxu1 %v3892_v17 }
 0x229   :  { %3303 = vmatprep.subr.bf16.mxu0 %v3893_v18  ;;  %3325 = vmatprep.subr.bf16.mxu1 %v3894_v19 }
 0x22c   :  { %3304 = vmatpush3.bf16.msra.mxu0 %v3895_v20  ;;  %3326 = vmatpush3.bf16.msra.mxu1 %v3896_v21 }
 0x2e2   :  { %v2473_v33 = vpop.f32.mrb[4].mxu0  ;;  %v2555_v34 = vpop.f32.mrb[4].mxu1 }
 0x2e3   :  { %v3337_v35 = vadd.f32 %v2473_v33, %v1741_v28  ;;  %v3339_v36 = vadd.f32 %v2555_v34, %v1749_v29  ;;  %v2475_v37 = vpop.f32.mrb[5].mxu0  ;;  %v2557_v38 = vpop.f32.mrb[5].mxu1 }
 0x2e4   :  { %v3338_v40 = vadd.f32 %v2475_v37, %v1745_v30  ;;  %v3340_v41 = vadd.f32 %v2557_v38, %v1753_v32  ;;  %v2477_v42 = vpop.f32.mrb[6].mxu0  ;;  %v2559_v43 = vpop.f32.mrb[6].mxu1 }
 0x2e5   :  { %v2562_v23 = vmax.f32 %v3337_v35, 0.0  ;;  %v2564_v44 = vmax.f32 %v3339_v36, 0.0  ;;  %v2478_v45 = vpop.f32.mrb[7].mxu0  ;;  %v2560_v39 = vpop.f32.mrb[7].mxu1 }
 0x2e6   :  { %v2563_v46 = vmax.f32 %v3338_v40, 0.0  ;;  %v2565_v47 = vmax.f32 %v3340_v41, 0.0 }
 0x2e7   :  { %v2566_v22 = vpack.c.bf16 %v2562_v23, %v2562_v23  ;;  %v2568_v26 = vpack.c.bf16 %v2564_v44, %v2564_v44 }
 0x2e8   :  { %v2567_v25 = vpack.c.bf16 %v2563_v46, %v2563_v46  ;;  %v2569_v48 = vpack.c.bf16 %v2565_v47, %v2565_v47 }
 0x2ea   :  { %2865 = vmatprep.mubr.bf16.mxu0 %v2567_v25  ;;  %2905 = vmatprep.mubr.bf16.mxu1 %v2569_v48 }
 0x2eb   :  { %2866 = vmatmul.mubr.bf16.vlgmr.msra.gmra.mrb[8].mxu0 %v2566_v22  ;;  %2906 = vmatmul.mubr.bf16.vlgmr.msra.gmra.mrb[8].mxu1 %v2568_v26 }
 0x3be   :  { %v3305_v49 = vpop.f32.mrb[8].mxu0  ;;  %v3327_v50 = vpop.f32.mrb[8].mxu1 }
 0x3bf   :  { %v3306_v52 = vpop.f32.mrb[9].mxu0  ;;  %v3328_v53 = vpop.f32.mrb[9].mxu1 }
 0x3c0   :  { %v3307_v54 = vadd.f32 %v3306_v52, %v3305_v49  ;;  %v3329_v24 = vadd.f32 %v3328_v53, %v3327_v50  ;;  %v3308_v55 = vpop.f32.mrb[10].mxu0  ;;  %v3330_v31 = vpop.f32.mrb[10].mxu1 }
 0x3c1   :  { %v3309_v56 = vpop.f32.mrb[11].mxu0  ;;  %v3331_v57 = vpop.f32.mrb[11].mxu1 }
 0x3c2   :  { %v2868_v58 = vadd.f32 %v3307_v54, %v3256_v51 }
 0x3c4   :  { %v2908_v59 = vadd.f32 %v3329_v24, %v2868_v58 }
 0x3c6   :  { %2913 = vst [vmem:[#allocation7] sm:$0xff] %v2908_v59 }
 0x3c7   :  { %3952 = shalt.err (!%p3949_p6)
}
 0x3c8   :  { %s3953_s30 = scalar_lea.hbm %s4215_s7, 128 }
 0x3c9   :  { %p3954_p7 = scmp.ne.s32.totalorder %s4215_s7, %s3953_s30  ;;  %p3957_p8 = scmp.lt.u32.totalorder %s3953_s30, %s4215_s7 }
 0x3cb   :  { %p3959_p9 = pnand %p3957_p8, %p3954_p7 }
 0x3cd   :  { %3962 = shalt.err (!%p3959_p9)
}
 0x3ce   :  { %2923 = dma.vmem_to_hbm [thread:$0]  %s2921_s27, 128, %s4215_s7, [#allocation4]  }
 0x3cf   :  { %3967 = dma.done.wait [#allocation4], 128  }
 0x3d0   :  { %3968 = vsyncadd [#allocation4], 4294967168 }
 0x3d1   :  { %2927 = vsyncpa [#allocation3], 1 }
 0x3d2   :  { %2928 = vsyncpa [#allocation6], 1 }
 0x3d3   :  { %2929 = vsyncpa [#allocation4], 1 }

</bundles_post_ra>
